<compile_context>
chip_gen: v7x
topology: tpu7x:2x2x1
jax: 0.10.0
libtpu: 0.0.40
codegen_flags: <defaults>
</compile_context>

<pallas_src>
import functools

import jax
import jax.numpy as jnp
from jax.experimental import pallas as pl
from jax.experimental.pallas import tpu as pltpu


# ----------------------------- kernel -------------------------------------- #

def _layernorm(x, gamma, beta, eps=1e-5):
    mean = jnp.mean(x, axis=-1, keepdims=True)
    var = jnp.mean(jnp.square(x - mean), axis=-1, keepdims=True)
    return (x - mean) * jax.lax.rsqrt(var + eps) * gamma + beta


def encoder_kernel(patches_ref, pw_ref, base_ref,
                   wq_ref, wk_ref, wv_ref, bq_ref, bk_ref, bv_ref,
                   wo_ref, bo_ref, g1_ref, be1_ref,
                   w1_ref, b1_ref, w2_ref, b2_ref, g2_ref, be2_ref,
                   wp_ref, bp_ref,
                   tok_ref, head_ref, x_scr,
                   *, B, S, Sp, nhead):
    l = pl.program_id(0)
    P = pw_ref.shape[0]
    E = pw_ref.shape[1]
    hd = E // nhead
    scale = 1.0 / (float(hd) ** 0.5)

    # ---- step 0: patch embedding + cls + pos, written once into the resident stream.
    # patches_ref rows for the cls slot / pad slots are zero, so one matmul + one add
    # of the pre-merged (cls+pos / bias+pos) base table builds the full token tensor.
    @pl.when(l == 0)
    def _():
        tok = jnp.dot(patches_ref[...].reshape(B * Sp, P), pw_ref[...],
                      preferred_element_type=jnp.float32)
        x_scr[...] = tok.reshape(B, Sp, E) + base_ref[...][None, :, :]

    # ---- transformer encoder layer `l` (post-norm, ReLU FFN, PyTorch semantics).
    x3 = x_scr[...]                                    # (B, Sp, E) f32
    x2 = x3.reshape(B * Sp, E)
    xb = x2.astype(jnp.bfloat16)                       # MXU operands in bf16

    wq = wq_ref[0]; wk = wk_ref[0]; wv = wv_ref[0]; wo = wo_ref[0]

    q = (jnp.dot(xb, wq, preferred_element_type=jnp.float32) + bq_ref[0]) * scale
    k = jnp.dot(xb, wk, preferred_element_type=jnp.float32) + bk_ref[0]
    v = jnp.dot(xb, wv, preferred_element_type=jnp.float32) + bv_ref[0]
    q3 = q.reshape(B, Sp, E)
    k3 = k.reshape(B, Sp, E)
    v3 = v.reshape(B, Sp, E)

    # mask padded key positions (>= S) so pad tokens never receive attention weight.
    kmask = jax.lax.broadcasted_iota(jnp.int32, (1, 1, Sp), 2) < S

    attn = None
    for h in range(nhead):                             # static unroll over heads
        sl = slice(h * hd, (h + 1) * hd)
        qh = q3[:, :, sl]
        kh = k3[:, :, sl]
        vh = v3[:, :, sl]
        s = jnp.einsum('bqd,bkd->bqk', qh, kh,
                       preferred_element_type=jnp.float32)      # (B, Sp, Sp)
        s = jnp.where(kmask, s, -1e30)
        p = jnp.exp(s - jnp.max(s, axis=-1, keepdims=True))
        p = p * pl.reciprocal(jnp.sum(p, axis=-1, keepdims=True), approx=True)
        oh = jnp.einsum('bqk,bkd->bqd', p, vh,
                        preferred_element_type=jnp.float32)     # (B, Sp, hd)
        # fold this head's slice of the output projection: (B*Sp, hd) @ (hd, E)
        contrib = jnp.dot(oh.reshape(B * Sp, hd).astype(jnp.bfloat16),
                          wo[sl, :], preferred_element_type=jnp.float32)
        attn = contrib if attn is None else attn + contrib
    attn = attn + bo_ref[0]

    h1 = _layernorm(x2 + attn, g1_ref[0], be1_ref[0])

    ff = jnp.dot(h1.astype(jnp.bfloat16), w1_ref[0],
                 preferred_element_type=jnp.float32) + b1_ref[0]
    ff = jnp.maximum(ff, 0.0)                                   # ReLU
    ff = jnp.dot(ff.astype(jnp.bfloat16), w2_ref[0],
                 preferred_element_type=jnp.float32) + b2_ref[0]

    y = _layernorm(h1 + ff, g2_ref[0], be2_ref[0])              # (B*Sp, E)
    x_scr[...] = y.reshape(B, Sp, E)

    # ---- final step: emit tokens + fused classification head.
    @pl.when(l == pl.num_programs(0) - 1)
    def _():
        y3 = y.reshape(B, Sp, E)
        tok_ref[...] = y3
        cls_tok = y3[:, 0, :]                                   # (B, E)
        head_ref[...] = jnp.dot(cls_tok, wp_ref[...],
                                preferred_element_type=jnp.float32) + bp_ref[...]


# ----------------------------- wrapper -------------------------------------- #

def spectra_encoder(x, params, *, patch_size, nhead):
    pw, pb, cls_tok, pos = params["patch"]
    B, L = x.shape
    P = patch_size
    N = L // P
    S = N + 1
    E = pw.shape[1]
    Sp = max(8, ((S + 7) // 8) * 8)                     # pad tokens to sublane multiple
    lay = params["layers"]
    depth = lay["wq"].shape[0]
    wp, bp = params["proj"]
    OUT = wp.shape[1]

    # patchify (intended semantics of PatchEmbed1D, in_chans=1) + pad:
    # row 0 is the cls slot (zero patch), rows 1..N are patches, rest are pad rows.
    patches = x.reshape(B, N, P)
    patches_pad = jnp.pad(patches, ((0, 0), (1, Sp - 1 - N), (0, 0)))
    # additive row table: cls+pos[0] for the cls row, proj-bias+pos for patch rows,
    # zeros for pad rows.
    base = jnp.concatenate(
        [cls_tok + pos[0:1], pb + pos[1:S],
         jnp.zeros((Sp - S, E), jnp.float32)], axis=0)          # (Sp, E)

    def const_spec(shape):
        return pl.BlockSpec(shape, lambda l: (0,) * len(shape))

    def layer_spec(arr):
        nd = arr.ndim
        return pl.BlockSpec((1,) + arr.shape[1:],
                            lambda l: (l,) + (0,) * (nd - 1))

    kernel = functools.partial(encoder_kernel, B=B, S=S, Sp=Sp, nhead=nhead)

    tok_out, head_out = pl.pallas_call(
        kernel,
        out_shape=(jax.ShapeDtypeStruct((B, Sp, E), jnp.float32),
                   jax.ShapeDtypeStruct((B, OUT), jnp.float32)),
        grid=(depth,),
        in_specs=[
            const_spec((B, Sp, P)),          # patches_pad
            const_spec((P, E)),              # pw
            const_spec((Sp, E)),             # base
            layer_spec(lay["wq"]), layer_spec(lay["wk"]), layer_spec(lay["wv"]),
            layer_spec(lay["bq"]), layer_spec(lay["bk"]), layer_spec(lay["bv"]),
            layer_spec(lay["wo"]), layer_spec(lay["bo"]),
            layer_spec(lay["g1"]), layer_spec(lay["be1"]),
            layer_spec(lay["w1"]), layer_spec(lay["b1"]),
            layer_spec(lay["w2"]), layer_spec(lay["b2"]),
            layer_spec(lay["g2"]), layer_spec(lay["be2"]),
            const_spec((E, OUT)),            # wp
            const_spec((1, OUT)),            # bp
        ],
        out_specs=(pl.BlockSpec((B, Sp, E), lambda l: (0, 0, 0)),
                   pl.BlockSpec((B, OUT), lambda l: (0, 0))),
        scratch_shapes=[pltpu.VMEM((B, Sp, E), jnp.float32)],   # resident residual
        compiler_params=pltpu.CompilerParams(
            dimension_semantics=("arbitrary",),
            vmem_limit_bytes=32 * 1024 * 1024),
    )(patches_pad, pw, base,
      lay["wq"], lay["wk"], lay["wv"], lay["bq"], lay["bk"], lay["bv"],
      lay["wo"], lay["bo"], lay["g1"], lay["be1"],
      lay["w1"], lay["b1"], lay["w2"], lay["b2"], lay["g2"], lay["be2"],
      wp, bp)

    cls_out = head_out                                   # (B, out_dim)
    patch_tokens = tok_out[:, 1:S, :]                    # (B, N, E), drop cls + pad
    return cls_out, patch_tokens


# ----------------------------- params --------------------------------------- #

def init_params(key, *, P, E, S, nhead, depth, F, out_dim):
    ks = jax.random.split(key, 20)

    def w(kk, shape, scale=0.05, dtype=jnp.float32):
        return (jax.random.normal(kk, shape, jnp.float32) * scale).astype(dtype)

    bf = jnp.bfloat16
    params = {
        "patch": (w(ks[0], (P, E)),                 # proj weight (f32, tiny)
                  w(ks[1], (1, E), 0.02),           # proj bias
                  w(ks[2], (1, E), 0.02),           # cls token
                  w(ks[3], (S, E), 0.02)),          # pos embed
        "layers": dict(
            wq=w(ks[4], (depth, E, E), dtype=bf),
            wk=w(ks[5], (depth, E, E), dtype=bf),
            wv=w(ks[6], (depth, E, E), dtype=bf),
            bq=w(ks[7], (depth, 1, E), 0.02),
            bk=w(ks[8], (depth, 1, E), 0.02),
            bv=w(ks[9], (depth, 1, E), 0.02),
            wo=w(ks[10], (depth, E, E), dtype=bf),
            bo=w(ks[11], (depth, 1, E), 0.02),
            g1=jnp.ones((depth, 1, E), jnp.float32),
            be1=jnp.zeros((depth, 1, E), jnp.float32),
            w1=w(ks[12], (depth, E, F), dtype=bf),
            b1=w(ks[13], (depth, 1, F), 0.02),
            w2=w(ks[14], (depth, F, E), dtype=bf),
            b2=w(ks[15], (depth, 1, E), 0.02),
            g2=jnp.ones((depth, 1, E), jnp.float32),
            be2=jnp.zeros((depth, 1, E), jnp.float32),
        ),
        "proj": (w(ks[16], (E, out_dim)),           # head weight (f32, tiny)
                 w(ks[17], (1, out_dim), 0.02)),
    }
    return params


# ----------------------------- main ------------------------------------------ #

if __name__ == "__main__":
    B = 2
    L = 64          # seq_len (scaled down from 4000)
    P = 8           # patch_size (scaled down from 40)
    E = 32          # embed_dim
    NHEAD = 4
    DEPTH = 2
    FFN = 64        # dim_feedforward (scaled down from torch default 2048)
    OUT = 32        # out_dim
    N = L // P
    S = N + 1

    key = jax.random.PRNGKey(0)
    kx, kp = jax.random.split(key)
    x = jax.random.normal(kx, (B, L), jnp.float32)
    params = init_params(kp, P=P, E=E, S=S, nhead=NHEAD, depth=DEPTH, F=FFN,
                         out_dim=OUT)

    fwd = jax.jit(functools.partial(spectra_encoder, patch_size=P, nhead=NHEAD))
    cls_out, patch_tokens = fwd(x, params)
    jax.block_until_ready((cls_out, patch_tokens))

    assert cls_out.shape == (B, OUT)
    assert patch_tokens.shape == (B, N, E)
    assert bool(jnp.all(jnp.isfinite(cls_out))) and bool(jnp.all(jnp.isfinite(patch_tokens)))
    print("KERNEL_OK")
</pallas_src>

<mosaic_0001>
module attributes {stable_mosaic.version = 11 : i64} {
  func.func @encoder_kernel(%arg0: i32, %arg1: memref<2x16x8xf32, #tpu.memory_space<vmem>>, %arg2: memref<8x32xf32, #tpu.memory_space<vmem>>, %arg3: memref<16x32xf32, #tpu.memory_space<vmem>>, %arg4: memref<1x32x32xbf16, #tpu.memory_space<vmem>>, %arg5: memref<1x32x32xbf16, #tpu.memory_space<vmem>>, %arg6: memref<1x32x32xbf16, #tpu.memory_space<vmem>>, %arg7: memref<1x1x32xf32, #tpu.memory_space<vmem>>, %arg8: memref<1x1x32xf32, #tpu.memory_space<vmem>>, %arg9: memref<1x1x32xf32, #tpu.memory_space<vmem>>, %arg10: memref<1x32x32xbf16, #tpu.memory_space<vmem>>, %arg11: memref<1x1x32xf32, #tpu.memory_space<vmem>>, %arg12: memref<1x1x32xf32, #tpu.memory_space<vmem>>, %arg13: memref<1x1x32xf32, #tpu.memory_space<vmem>>, %arg14: memref<1x32x64xbf16, #tpu.memory_space<vmem>>, %arg15: memref<1x1x64xf32, #tpu.memory_space<vmem>>, %arg16: memref<1x64x32xbf16, #tpu.memory_space<vmem>>, %arg17: memref<1x1x32xf32, #tpu.memory_space<vmem>>, %arg18: memref<1x1x32xf32, #tpu.memory_space<vmem>>, %arg19: memref<1x1x32xf32, #tpu.memory_space<vmem>>, %arg20: memref<32x32xf32, #tpu.memory_space<vmem>>, %arg21: memref<1x32xf32, #tpu.memory_space<vmem>>, %arg22: memref<2x16x32xf32, #tpu.memory_space<vmem>>, %arg23: memref<2x32xf32, #tpu.memory_space<vmem>>, %arg24: memref<2x16x32xf32, #tpu.memory_space<vmem>>) attributes {dimension_semantics = [#tpu.dimension_semantics<arbitrary>], iteration_bounds = array<i64: 2>, scalar_prefetch = 0 : i64, scratch_operands = 1 : i64, tpu.core_type = #tpu.core_type<tc>, window_params = [{pipeline_mode = #tpu.pipeline_mode<synchronous>, transform_indices = @transform_0, window_bounds = array<i64: 2, 16, 8>}, {pipeline_mode = #tpu.pipeline_mode<synchronous>, transform_indices = @transform_1, window_bounds = array<i64: 8, 32>}, {pipeline_mode = #tpu.pipeline_mode<synchronous>, transform_indices = @transform_2, window_bounds = array<i64: 16, 32>}, {transform_indices = @transform_3, window_bounds = array<i64: 1, 32, 32>}, {transform_indices = @transform_4, window_bounds = array<i64: 1, 32, 32>}, {transform_indices = @transform_5, window_bounds = array<i64: 1, 32, 32>}, {transform_indices = @transform_6, window_bounds = array<i64: 1, 1, 32>}, {transform_indices = @transform_7, window_bounds = array<i64: 1, 1, 32>}, {transform_indices = @transform_8, window_bounds = array<i64: 1, 1, 32>}, {transform_indices = @transform_9, window_bounds = array<i64: 1, 32, 32>}, {transform_indices = @transform_10, window_bounds = array<i64: 1, 1, 32>}, {transform_indices = @transform_11, window_bounds = array<i64: 1, 1, 32>}, {transform_indices = @transform_12, window_bounds = array<i64: 1, 1, 32>}, {transform_indices = @transform_13, window_bounds = array<i64: 1, 32, 64>}, {transform_indices = @transform_14, window_bounds = array<i64: 1, 1, 64>}, {transform_indices = @transform_15, window_bounds = array<i64: 1, 64, 32>}, {transform_indices = @transform_16, window_bounds = array<i64: 1, 1, 32>}, {transform_indices = @transform_17, window_bounds = array<i64: 1, 1, 32>}, {transform_indices = @transform_18, window_bounds = array<i64: 1, 1, 32>}, {pipeline_mode = #tpu.pipeline_mode<synchronous>, transform_indices = @transform_19, window_bounds = array<i64: 32, 32>}, {pipeline_mode = #tpu.pipeline_mode<synchronous>, transform_indices = @transform_20, window_bounds = array<i64: 1, 32>}, {pipeline_mode = #tpu.pipeline_mode<synchronous>, transform_indices = @transform_21, window_bounds = array<i64: 2, 16, 32>}, {pipeline_mode = #tpu.pipeline_mode<synchronous>, transform_indices = @transform_22, window_bounds = array<i64: 2, 32>}]} {
    %c0_i32 = arith.constant 0 : i32
    %0 = arith.cmpi eq, %arg0, %c0_i32 : i32
    %1 = arith.extui %0 : i1 to i32
    %c0_i32_0 = arith.constant 0 : i32
    %2 = arith.cmpi ne, %1, %c0_i32_0 : i32
    scf.if %2 {
      %c0_95 = arith.constant 0 : index
      %c0_96 = arith.constant 0 : index
      %c0_97 = arith.constant 0 : index
      %213 = vector.load %arg1[%c0_95, %c0_96, %c0_97] : memref<2x16x8xf32, #tpu.memory_space<vmem>>, vector<2x16x8xf32>
      %214 = vector.shape_cast %213 : vector<2x16x8xf32> to vector<32x8xf32>
      %c0_98 = arith.constant 0 : index
      %c0_99 = arith.constant 0 : index
      %215 = vector.load %arg2[%c0_98, %c0_99] : memref<8x32xf32, #tpu.memory_space<vmem>>, vector<8x32xf32>
      %cst_100 = arith.constant dense<0.000000e+00> : vector<32x32xf32>
      %216 = tpu.matmul %214, %215, %cst_100 {dimension_numbers = #tpu.dot_dimension_numbers<[1], [0], [0], [1], [0, 0, 1, 1], [], []>} : vector<32x8xf32>, vector<8x32xf32>, vector<32x32xf32> -> vector<32x32xf32>
      %217 = vector.shape_cast %216 : vector<32x32xf32> to vector<2x16x32xf32>
      %c0_101 = arith.constant 0 : index
      %c0_102 = arith.constant 0 : index
      %218 = vector.load %arg3[%c0_101, %c0_102] : memref<16x32xf32, #tpu.memory_space<vmem>>, vector<16x32xf32>
      %219 = vector.shape_cast %218 : vector<16x32xf32> to vector<1x16x32xf32>
      %220 = vector.broadcast %219 : vector<1x16x32xf32> to vector<2x16x32xf32>
      %221 = arith.addf %217, %220 : vector<2x16x32xf32>
      %c0_103 = arith.constant 0 : index
      %c0_104 = arith.constant 0 : index
      %c0_105 = arith.constant 0 : index
      %222 = vector.load %arg24[%c0_103, %c0_104, %c0_105] : memref<2x16x32xf32, #tpu.memory_space<vmem>>, vector<2x16x32xf32>
      tpu.vector_store %arg24[%c0_103, %c0_104, %c0_105], %221 {strides = array<i32>} : memref<2x16x32xf32, #tpu.memory_space<vmem>>, vector<2x16x32xf32>,
    } else {
    }
    %c0 = arith.constant 0 : index
    %c0_1 = arith.constant 0 : index
    %c0_2 = arith.constant 0 : index
    %3 = vector.load %arg24[%c0, %c0_1, %c0_2] : memref<2x16x32xf32, #tpu.memory_space<vmem>>, vector<2x16x32xf32>
    %4 = vector.shape_cast %3 : vector<2x16x32xf32> to vector<32x32xf32>
    %5 = arith.truncf %4 : vector<32x32xf32> to vector<32x32xbf16>
    %c0_3 = arith.constant 0 : index
    %c0_4 = arith.constant 0 : index
    %c0_5 = arith.constant 0 : index
    %6 = vector.load %arg4[%c0_3, %c0_4, %c0_5] : memref<1x32x32xbf16, #tpu.memory_space<vmem>>, vector<1x32x32xbf16>
    %7 = vector.shape_cast %6 : vector<1x32x32xbf16> to vector<32x32xbf16>
    %c0_6 = arith.constant 0 : index
    %c0_7 = arith.constant 0 : index
    %c0_8 = arith.constant 0 : index
    %8 = vector.load %arg5[%c0_6, %c0_7, %c0_8] : memref<1x32x32xbf16, #tpu.memory_space<vmem>>, vector<1x32x32xbf16>
    %9 = vector.shape_cast %8 : vector<1x32x32xbf16> to vector<32x32xbf16>
    %c0_9 = arith.constant 0 : index
    %c0_10 = arith.constant 0 : index
    %c0_11 = arith.constant 0 : index
    %10 = vector.load %arg6[%c0_9, %c0_10, %c0_11] : memref<1x32x32xbf16, #tpu.memory_space<vmem>>, vector<1x32x32xbf16>
    %11 = vector.shape_cast %10 : vector<1x32x32xbf16> to vector<32x32xbf16>
    %c0_12 = arith.constant 0 : index
    %c0_13 = arith.constant 0 : index
    %c0_14 = arith.constant 0 : index
    %12 = vector.load %arg10[%c0_12, %c0_13, %c0_14] : memref<1x32x32xbf16, #tpu.memory_space<vmem>>, vector<1x32x32xbf16>
    %13 = vector.shape_cast %12 : vector<1x32x32xbf16> to vector<32x32xbf16>
    %cst = arith.constant dense<0.000000e+00> : vector<32x32xf32>
    %14 = tpu.matmul %5, %7, %cst {dimension_numbers = #tpu.dot_dimension_numbers<[1], [0], [0], [1], [0, 0, 1, 1], [], []>} : vector<32x32xbf16>, vector<32x32xbf16>, vector<32x32xf32> -> vector<32x32xf32>
    %c0_15 = arith.constant 0 : index
    %c0_16 = arith.constant 0 : index
    %c0_17 = arith.constant 0 : index
    %15 = vector.load %arg7[%c0_15, %c0_16, %c0_17] : memref<1x1x32xf32, #tpu.memory_space<vmem>>, vector<1x1x32xf32>
    %16 = vector.shape_cast %15 : vector<1x1x32xf32> to vector<1x32xf32>
    %17 = vector.broadcast %16 : vector<1x32xf32> to vector<32x32xf32>
    %18 = arith.addf %14, %17 : vector<32x32xf32>
    %cst_18 = arith.constant 0.353553385 : f32
    %19 = vector.broadcast %cst_18 : f32 to vector<32x32xf32>
    %20 = arith.mulf %18, %19 : vector<32x32xf32>
    %cst_19 = arith.constant dense<0.000000e+00> : vector<32x32xf32>
    %21 = tpu.matmul %5, %9, %cst_19 {dimension_numbers = #tpu.dot_dimension_numbers<[1], [0], [0], [1], [0, 0, 1, 1], [], []>} : vector<32x32xbf16>, vector<32x32xbf16>, vector<32x32xf32> -> vector<32x32xf32>
    %c0_20 = arith.constant 0 : index
    %c0_21 = arith.constant 0 : index
    %c0_22 = arith.constant 0 : index
    %22 = vector.load %arg8[%c0_20, %c0_21, %c0_22] : memref<1x1x32xf32, #tpu.memory_space<vmem>>, vector<1x1x32xf32>
    %23 = vector.shape_cast %22 : vector<1x1x32xf32> to vector<1x32xf32>
    %24 = vector.broadcast %23 : vector<1x32xf32> to vector<32x32xf32>
    %25 = arith.addf %21, %24 : vector<32x32xf32>
    %cst_23 = arith.constant dense<0.000000e+00> : vector<32x32xf32>
    %26 = tpu.matmul %5, %11, %cst_23 {dimension_numbers = #tpu.dot_dimension_numbers<[1], [0], [0], [1], [0, 0, 1, 1], [], []>} : vector<32x32xbf16>, vector<32x32xbf16>, vector<32x32xf32> -> vector<32x32xf32>
    %c0_24 = arith.constant 0 : index
    %c0_25 = arith.constant 0 : index
    %c0_26 = arith.constant 0 : index
    %27 = vector.load %arg9[%c0_24, %c0_25, %c0_26] : memref<1x1x32xf32, #tpu.memory_space<vmem>>, vector<1x1x32xf32>
    %28 = vector.shape_cast %27 : vector<1x1x32xf32> to vector<1x32xf32>
    %29 = vector.broadcast %28 : vector<1x32xf32> to vector<32x32xf32>
    %30 = arith.addf %26, %29 : vector<32x32xf32>
    %31 = vector.shape_cast %20 : vector<32x32xf32> to vector<2x16x32xf32>
    %32 = vector.shape_cast %25 : vector<32x32xf32> to vector<2x16x32xf32>
    %33 = vector.shape_cast %30 : vector<32x32xf32> to vector<2x16x32xf32>
    %34 = tpu.iota {dimensions = array<i32: 2>} : vector<1x1x16xi32>
    %c9_i32 = arith.constant 9 : i32
    %35 = vector.broadcast %c9_i32 : i32 to vector<1x1x16xi32>
    %36 = arith.cmpi slt, %34, %35 : vector<1x1x16xi32>
    %37 = vector.extract_strided_slice %31 {offsets = [0, 0, 0], sizes = [2, 16, 8], strides = [1, 1, 1]} : vector<2x16x32xf32> to vector<2x16x8xf32>
    %38 = vector.extract_strided_slice %32 {offsets = [0, 0, 0], sizes = [2, 16, 8], strides = [1, 1, 1]} : vector<2x16x32xf32> to vector<2x16x8xf32>
    %39 = vector.extract_strided_slice %33 {offsets = [0, 0, 0], sizes = [2, 16, 8], strides = [1, 1, 1]} : vector<2x16x32xf32> to vector<2x16x8xf32>
    "tpu.trace_start"() <{level = 10 : i32, message = "bqd,bkd->bqk"}> : () -> ()
    %cst_27 = arith.constant dense<0.000000e+00> : vector<2x16x16xf32>
    %40 = tpu.matmul %37, %38, %cst_27 {dimension_numbers = #tpu.dot_dimension_numbers<[2], [2], [1], [1], [0, 0, 0, 1, 1, 1], [0], [0]>} : vector<2x16x8xf32>, vector<2x16x8xf32>, vector<2x16x16xf32> -> vector<2x16x16xf32>
    %cst_28 = arith.constant -1.000000e+30 : f32
    "tpu.trace_stop"() : () -> ()
    %41 = vector.shape_cast %36 : vector<1x1x16xi1> to vector<1x1x16xi1>
    %42 = vector.broadcast %41 : vector<1x1x16xi1> to vector<2x16x16xi1>
    %43 = vector.broadcast %cst_28 : f32 to vector<2x16x16xf32>
    %44 = arith.select %42, %40, %43 : vector<2x16x16xi1>, vector<2x16x16xf32>
    %cst_29 = arith.constant dense<0xFF800000> : vector<2x16xf32>
    %45 = vector.multi_reduction <maximumf>, %44, %cst_29 [2] : vector<2x16x16xf32> to vector<2x16xf32>
    %46 = vector.shape_cast %45 : vector<2x16xf32> to vector<2x16x1xf32>
    %47 = vector.broadcast %46 : vector<2x16x1xf32> to vector<2x16x16xf32>
    %48 = arith.subf %44, %47 : vector<2x16x16xf32>
    %49 = math.exp %48 : vector<2x16x16xf32>
    %cst_30 = arith.constant dense<0.000000e+00> : vector<2x16xf32>
    %50 = vector.multi_reduction <add>, %49, %cst_30 [2] : vector<2x16x16xf32> to vector<2x16xf32>
    %51 = vector.shape_cast %50 : vector<2x16xf32> to vector<2x16x1xf32>
    %52 = tpu.reciprocal %51 {approx = true} : vector<2x16x1xf32> -> vector<2x16x1xf32>
    %53 = vector.broadcast %52 : vector<2x16x1xf32> to vector<2x16x16xf32>
    %54 = arith.mulf %49, %53 : vector<2x16x16xf32>
    "tpu.trace_start"() <{level = 10 : i32, message = "bqk,bkd->bqd"}> : () -> ()
    %cst_31 = arith.constant dense<0.000000e+00> : vector<2x16x8xf32>
    %55 = tpu.matmul %54, %39, %cst_31 {dimension_numbers = #tpu.dot_dimension_numbers<[2], [1], [1], [2], [0, 0, 0, 1, 1, 2], [0], [0]>} : vector<2x16x16xf32>, vector<2x16x8xf32>, vector<2x16x8xf32> -> vector<2x16x8xf32>
    "tpu.trace_stop"() : () -> ()
    %56 = vector.shape_cast %55 : vector<2x16x8xf32> to vector<32x8xf32>
    %57 = arith.truncf %56 : vector<32x8xf32> to vector<32x8xbf16>
    %58 = vector.extract_strided_slice %13 {offsets = [0, 0], sizes = [8, 32], strides = [1, 1]} : vector<32x32xbf16> to vector<8x32xbf16>
    %cst_32 = arith.constant dense<0.000000e+00> : vector<32x32xf32>
    %59 = tpu.matmul %57, %58, %cst_32 {dimension_numbers = #tpu.dot_dimension_numbers<[1], [0], [0], [1], [0, 0, 1, 1], [], []>} : vector<32x8xbf16>, vector<8x32xbf16>, vector<32x32xf32> -> vector<32x32xf32>
    %60 = vector.extract_strided_slice %31 {offsets = [0, 0, 8], sizes = [2, 16, 8], strides = [1, 1, 1]} : vector<2x16x32xf32> to vector<2x16x8xf32>
    %61 = vector.extract_strided_slice %32 {offsets = [0, 0, 8], sizes = [2, 16, 8], strides = [1, 1, 1]} : vector<2x16x32xf32> to vector<2x16x8xf32>
    %62 = vector.extract_strided_slice %33 {offsets = [0, 0, 8], sizes = [2, 16, 8], strides = [1, 1, 1]} : vector<2x16x32xf32> to vector<2x16x8xf32>
    "tpu.trace_start"() <{level = 10 : i32, message = "bqd,bkd->bqk"}> : () -> ()
    %cst_33 = arith.constant dense<0.000000e+00> : vector<2x16x16xf32>
    %63 = tpu.matmul %60, %61, %cst_33 {dimension_numbers = #tpu.dot_dimension_numbers<[2], [2], [1], [1], [0, 0, 0, 1, 1, 1], [0], [0]>} : vector<2x16x8xf32>, vector<2x16x8xf32>, vector<2x16x16xf32> -> vector<2x16x16xf32>
    %cst_34 = arith.constant -1.000000e+30 : f32
    "tpu.trace_stop"() : () -> ()
    %64 = vector.shape_cast %36 : vector<1x1x16xi1> to vector<1x1x16xi1>
    %65 = vector.broadcast %64 : vector<1x1x16xi1> to vector<2x16x16xi1>
    %66 = vector.broadcast %cst_34 : f32 to vector<2x16x16xf32>
    %67 = arith.select %65, %63, %66 : vector<2x16x16xi1>, vector<2x16x16xf32>
    %cst_35 = arith.constant dense<0xFF800000> : vector<2x16xf32>
    %68 = vector.multi_reduction <maximumf>, %67, %cst_35 [2] : vector<2x16x16xf32> to vector<2x16xf32>
    %69 = vector.shape_cast %68 : vector<2x16xf32> to vector<2x16x1xf32>
    %70 = vector.broadcast %69 : vector<2x16x1xf32> to vector<2x16x16xf32>
    %71 = arith.subf %67, %70 : vector<2x16x16xf32>
    %72 = math.exp %71 : vector<2x16x16xf32>
    %cst_36 = arith.constant dense<0.000000e+00> : vector<2x16xf32>
    %73 = vector.multi_reduction <add>, %72, %cst_36 [2] : vector<2x16x16xf32> to vector<2x16xf32>
    %74 = vector.shape_cast %73 : vector<2x16xf32> to vector<2x16x1xf32>
    %75 = tpu.reciprocal %74 {approx = true} : vector<2x16x1xf32> -> vector<2x16x1xf32>
    %76 = vector.broadcast %75 : vector<2x16x1xf32> to vector<2x16x16xf32>
    %77 = arith.mulf %72, %76 : vector<2x16x16xf32>
    "tpu.trace_start"() <{level = 10 : i32, message = "bqk,bkd->bqd"}> : () -> ()
    %cst_37 = arith.constant dense<0.000000e+00> : vector<2x16x8xf32>
    %78 = tpu.matmul %77, %62, %cst_37 {dimension_numbers = #tpu.dot_dimension_numbers<[2], [1], [1], [2], [0, 0, 0, 1, 1, 2], [0], [0]>} : vector<2x16x16xf32>, vector<2x16x8xf32>, vector<2x16x8xf32> -> vector<2x16x8xf32>
    "tpu.trace_stop"() : () -> ()
    %79 = vector.shape_cast %78 : vector<2x16x8xf32> to vector<32x8xf32>
    %80 = arith.truncf %79 : vector<32x8xf32> to vector<32x8xbf16>
    %81 = vector.extract_strided_slice %13 {offsets = [8, 0], sizes = [8, 32], strides = [1, 1]} : vector<32x32xbf16> to vector<8x32xbf16>
    %cst_38 = arith.constant dense<0.000000e+00> : vector<32x32xf32>
    %82 = tpu.matmul %80, %81, %cst_38 {dimension_numbers = #tpu.dot_dimension_numbers<[1], [0], [0], [1], [0, 0, 1, 1], [], []>} : vector<32x8xbf16>, vector<8x32xbf16>, vector<32x32xf32> -> vector<32x32xf32>
    %83 = arith.addf %59, %82 : vector<32x32xf32>
    %84 = vector.extract_strided_slice %31 {offsets = [0, 0, 16], sizes = [2, 16, 8], strides = [1, 1, 1]} : vector<2x16x32xf32> to vector<2x16x8xf32>
    %85 = vector.extract_strided_slice %32 {offsets = [0, 0, 16], sizes = [2, 16, 8], strides = [1, 1, 1]} : vector<2x16x32xf32> to vector<2x16x8xf32>
    %86 = vector.extract_strided_slice %33 {offsets = [0, 0, 16], sizes = [2, 16, 8], strides = [1, 1, 1]} : vector<2x16x32xf32> to vector<2x16x8xf32>
    "tpu.trace_start"() <{level = 10 : i32, message = "bqd,bkd->bqk"}> : () -> ()
    %cst_39 = arith.constant dense<0.000000e+00> : vector<2x16x16xf32>
    %87 = tpu.matmul %84, %85, %cst_39 {dimension_numbers = #tpu.dot_dimension_numbers<[2], [2], [1], [1], [0, 0, 0, 1, 1, 1], [0], [0]>} : vector<2x16x8xf32>, vector<2x16x8xf32>, vector<2x16x16xf32> -> vector<2x16x16xf32>
    %cst_40 = arith.constant -1.000000e+30 : f32
    "tpu.trace_stop"() : () -> ()
    %88 = vector.shape_cast %36 : vector<1x1x16xi1> to vector<1x1x16xi1>
    %89 = vector.broadcast %88 : vector<1x1x16xi1> to vector<2x16x16xi1>
    %90 = vector.broadcast %cst_40 : f32 to vector<2x16x16xf32>
    %91 = arith.select %89, %87, %90 : vector<2x16x16xi1>, vector<2x16x16xf32>
    %cst_41 = arith.constant dense<0xFF800000> : vector<2x16xf32>
    %92 = vector.multi_reduction <maximumf>, %91, %cst_41 [2] : vector<2x16x16xf32> to vector<2x16xf32>
    %93 = vector.shape_cast %92 : vector<2x16xf32> to vector<2x16x1xf32>
    %94 = vector.broadcast %93 : vector<2x16x1xf32> to vector<2x16x16xf32>
    %95 = arith.subf %91, %94 : vector<2x16x16xf32>
    %96 = math.exp %95 : vector<2x16x16xf32>
    %cst_42 = arith.constant dense<0.000000e+00> : vector<2x16xf32>
    %97 = vector.multi_reduction <add>, %96, %cst_42 [2] : vector<2x16x16xf32> to vector<2x16xf32>
    %98 = vector.shape_cast %97 : vector<2x16xf32> to vector<2x16x1xf32>
    %99 = tpu.reciprocal %98 {approx = true} : vector<2x16x1xf32> -> vector<2x16x1xf32>
    %100 = vector.broadcast %99 : vector<2x16x1xf32> to vector<2x16x16xf32>
    %101 = arith.mulf %96, %100 : vector<2x16x16xf32>
    "tpu.trace_start"() <{level = 10 : i32, message = "bqk,bkd->bqd"}> : () -> ()
    %cst_43 = arith.constant dense<0.000000e+00> : vector<2x16x8xf32>
    %102 = tpu.matmul %101, %86, %cst_43 {dimension_numbers = #tpu.dot_dimension_numbers<[2], [1], [1], [2], [0, 0, 0, 1, 1, 2], [0], [0]>} : vector<2x16x16xf32>, vector<2x16x8xf32>, vector<2x16x8xf32> -> vector<2x16x8xf32>
    "tpu.trace_stop"() : () -> ()
    %103 = vector.shape_cast %102 : vector<2x16x8xf32> to vector<32x8xf32>
    %104 = arith.truncf %103 : vector<32x8xf32> to vector<32x8xbf16>
    %105 = vector.extract_strided_slice %13 {offsets = [16, 0], sizes = [8, 32], strides = [1, 1]} : vector<32x32xbf16> to vector<8x32xbf16>
    %cst_44 = arith.constant dense<0.000000e+00> : vector<32x32xf32>
    %106 = tpu.matmul %104, %105, %cst_44 {dimension_numbers = #tpu.dot_dimension_numbers<[1], [0], [0], [1], [0, 0, 1, 1], [], []>} : vector<32x8xbf16>, vector<8x32xbf16>, vector<32x32xf32> -> vector<32x32xf32>
    %107 = arith.addf %83, %106 : vector<32x32xf32>
    %108 = vector.extract_strided_slice %31 {offsets = [0, 0, 24], sizes = [2, 16, 8], strides = [1, 1, 1]} : vector<2x16x32xf32> to vector<2x16x8xf32>
    %109 = vector.extract_strided_slice %32 {offsets = [0, 0, 24], sizes = [2, 16, 8], strides = [1, 1, 1]} : vector<2x16x32xf32> to vector<2x16x8xf32>
    %110 = vector.extract_strided_slice %33 {offsets = [0, 0, 24], sizes = [2, 16, 8], strides = [1, 1, 1]} : vector<2x16x32xf32> to vector<2x16x8xf32>
    "tpu.trace_start"() <{level = 10 : i32, message = "bqd,bkd->bqk"}> : () -> ()
    %cst_45 = arith.constant dense<0.000000e+00> : vector<2x16x16xf32>
    %111 = tpu.matmul %108, %109, %cst_45 {dimension_numbers = #tpu.dot_dimension_numbers<[2], [2], [1], [1], [0, 0, 0, 1, 1, 1], [0], [0]>} : vector<2x16x8xf32>, vector<2x16x8xf32>, vector<2x16x16xf32> -> vector<2x16x16xf32>
    %cst_46 = arith.constant -1.000000e+30 : f32
    "tpu.trace_stop"() : () -> ()
    %112 = vector.shape_cast %36 : vector<1x1x16xi1> to vector<1x1x16xi1>
    %113 = vector.broadcast %112 : vector<1x1x16xi1> to vector<2x16x16xi1>
    %114 = vector.broadcast %cst_46 : f32 to vector<2x16x16xf32>
    %115 = arith.select %113, %111, %114 : vector<2x16x16xi1>, vector<2x16x16xf32>
    %cst_47 = arith.constant dense<0xFF800000> : vector<2x16xf32>
    %116 = vector.multi_reduction <maximumf>, %115, %cst_47 [2] : vector<2x16x16xf32> to vector<2x16xf32>
    %117 = vector.shape_cast %116 : vector<2x16xf32> to vector<2x16x1xf32>
    %118 = vector.broadcast %117 : vector<2x16x1xf32> to vector<2x16x16xf32>
    %119 = arith.subf %115, %118 : vector<2x16x16xf32>
    %120 = math.exp %119 : vector<2x16x16xf32>
    %cst_48 = arith.constant dense<0.000000e+00> : vector<2x16xf32>
    %121 = vector.multi_reduction <add>, %120, %cst_48 [2] : vector<2x16x16xf32> to vector<2x16xf32>
    %122 = vector.shape_cast %121 : vector<2x16xf32> to vector<2x16x1xf32>
    %123 = tpu.reciprocal %122 {approx = true} : vector<2x16x1xf32> -> vector<2x16x1xf32>
    %124 = vector.broadcast %123 : vector<2x16x1xf32> to vector<2x16x16xf32>
    %125 = arith.mulf %120, %124 : vector<2x16x16xf32>
    "tpu.trace_start"() <{level = 10 : i32, message = "bqk,bkd->bqd"}> : () -> ()
    %cst_49 = arith.constant dense<0.000000e+00> : vector<2x16x8xf32>
    %126 = tpu.matmul %125, %110, %cst_49 {dimension_numbers = #tpu.dot_dimension_numbers<[2], [1], [1], [2], [0, 0, 0, 1, 1, 2], [0], [0]>} : vector<2x16x16xf32>, vector<2x16x8xf32>, vector<2x16x8xf32> -> vector<2x16x8xf32>
    "tpu.trace_stop"() : () -> ()
    %127 = vector.shape_cast %126 : vector<2x16x8xf32> to vector<32x8xf32>
    %128 = arith.truncf %127 : vector<32x8xf32> to vector<32x8xbf16>
    %129 = vector.extract_strided_slice %13 {offsets = [24, 0], sizes = [8, 32], strides = [1, 1]} : vector<32x32xbf16> to vector<8x32xbf16>
    %cst_50 = arith.constant dense<0.000000e+00> : vector<32x32xf32>
    %130 = tpu.matmul %128, %129, %cst_50 {dimension_numbers = #tpu.dot_dimension_numbers<[1], [0], [0], [1], [0, 0, 1, 1], [], []>} : vector<32x8xbf16>, vector<8x32xbf16>, vector<32x32xf32> -> vector<32x32xf32>
    %131 = arith.addf %107, %130 : vector<32x32xf32>
    %c0_51 = arith.constant 0 : index
    %c0_52 = arith.constant 0 : index
    %c0_53 = arith.constant 0 : index
    %132 = vector.load %arg11[%c0_51, %c0_52, %c0_53] : memref<1x1x32xf32, #tpu.memory_space<vmem>>, vector<1x1x32xf32>
    %133 = vector.shape_cast %132 : vector<1x1x32xf32> to vector<1x32xf32>
    %134 = vector.broadcast %133 : vector<1x32xf32> to vector<32x32xf32>
    %135 = arith.addf %131, %134 : vector<32x32xf32>
    %136 = arith.addf %4, %135 : vector<32x32xf32>
    %c0_54 = arith.constant 0 : index
    %c0_55 = arith.constant 0 : index
    %c0_56 = arith.constant 0 : index
    %137 = vector.load %arg12[%c0_54, %c0_55, %c0_56] : memref<1x1x32xf32, #tpu.memory_space<vmem>>, vector<1x1x32xf32>
    %138 = vector.shape_cast %137 : vector<1x1x32xf32> to vector<1x32xf32>
    %c0_57 = arith.constant 0 : index
    %c0_58 = arith.constant 0 : index
    %c0_59 = arith.constant 0 : index
    %139 = vector.load %arg13[%c0_57, %c0_58, %c0_59] : memref<1x1x32xf32, #tpu.memory_space<vmem>>, vector<1x1x32xf32>
    %140 = vector.shape_cast %139 : vector<1x1x32xf32> to vector<1x32xf32>
    %cst_60 = arith.constant dense<0.000000e+00> : vector<32xf32>
    %141 = vector.multi_reduction <add>, %136, %cst_60 [1] : vector<32x32xf32> to vector<32xf32>
    %142 = vector.shape_cast %141 : vector<32xf32> to vector<32x1xf32>
    %cst_61 = arith.constant 3.200000e+01 : f32
    %143 = vector.broadcast %cst_61 : f32 to vector<32x1xf32>
    %144 = arith.divf %142, %143 : vector<32x1xf32>
    %145 = vector.broadcast %144 : vector<32x1xf32> to vector<32x32xf32>
    %146 = arith.subf %136, %145 : vector<32x32xf32>
    %147 = arith.mulf %146, %146 : vector<32x32xf32>
    %cst_62 = arith.constant dense<0.000000e+00> : vector<32xf32>
    %148 = vector.multi_reduction <add>, %147, %cst_62 [1] : vector<32x32xf32> to vector<32xf32>
    %149 = vector.shape_cast %148 : vector<32xf32> to vector<32x1xf32>
    %cst_63 = arith.constant 3.200000e+01 : f32
    %150 = vector.broadcast %cst_63 : f32 to vector<32x1xf32>
    %151 = arith.divf %149, %150 : vector<32x1xf32>
    %152 = vector.broadcast %144 : vector<32x1xf32> to vector<32x32xf32>
    %153 = arith.subf %136, %152 : vector<32x32xf32>
    %cst_64 = arith.constant 9.99999974E-6 : f32
    %154 = vector.broadcast %cst_64 : f32 to vector<32x1xf32>
    %155 = arith.addf %151, %154 : vector<32x1xf32>
    %156 = math.rsqrt %155 : vector<32x1xf32>
    %157 = vector.broadcast %156 : vector<32x1xf32> to vector<32x32xf32>
    %158 = arith.mulf %153, %157 : vector<32x32xf32>
    %159 = vector.broadcast %138 : vector<1x32xf32> to vector<32x32xf32>
    %160 = arith.mulf %158, %159 : vector<32x32xf32>
    %161 = vector.broadcast %140 : vector<1x32xf32> to vector<32x32xf32>
    %162 = arith.addf %160, %161 : vector<32x32xf32>
    %163 = arith.truncf %162 : vector<32x32xf32> to vector<32x32xbf16>
    %c0_65 = arith.constant 0 : index
    %c0_66 = arith.constant 0 : index
    %c0_67 = arith.constant 0 : index
    %164 = vector.load %arg14[%c0_65, %c0_66, %c0_67] : memref<1x32x64xbf16, #tpu.memory_space<vmem>>, vector<1x32x64xbf16>
    %165 = vector.shape_cast %164 : vector<1x32x64xbf16> to vector<32x64xbf16>
    %cst_68 = arith.constant dense<0.000000e+00> : vector<32x64xf32>
    %166 = tpu.matmul %163, %165, %cst_68 {dimension_numbers = #tpu.dot_dimension_numbers<[1], [0], [0], [1], [0, 0, 1, 1], [], []>} : vector<32x32xbf16>, vector<32x64xbf16>, vector<32x64xf32> -> vector<32x64xf32>
    %c0_69 = arith.constant 0 : index
    %c0_70 = arith.constant 0 : index
    %c0_71 = arith.constant 0 : index
    %167 = vector.load %arg15[%c0_69, %c0_70, %c0_71] : memref<1x1x64xf32, #tpu.memory_space<vmem>>, vector<1x1x64xf32>
    %168 = vector.shape_cast %167 : vector<1x1x64xf32> to vector<1x64xf32>
    %169 = vector.broadcast %168 : vector<1x64xf32> to vector<32x64xf32>
    %170 = arith.addf %166, %169 : vector<32x64xf32>
    %cst_72 = arith.constant 0.000000e+00 : f32
    %171 = vector.broadcast %cst_72 : f32 to vector<32x64xf32>
    %172 = arith.maximumf %170, %171 : vector<32x64xf32>
    %173 = arith.truncf %172 : vector<32x64xf32> to vector<32x64xbf16>
    %c0_73 = arith.constant 0 : index
    %c0_74 = arith.constant 0 : index
    %c0_75 = arith.constant 0 : index
    %174 = vector.load %arg16[%c0_73, %c0_74, %c0_75] : memref<1x64x32xbf16, #tpu.memory_space<vmem>>, vector<1x64x32xbf16>
    %175 = vector.shape_cast %174 : vector<1x64x32xbf16> to vector<64x32xbf16>
    %cst_76 = arith.constant dense<0.000000e+00> : vector<32x32xf32>
    %176 = tpu.matmul %173, %175, %cst_76 {dimension_numbers = #tpu.dot_dimension_numbers<[1], [0], [0], [1], [0, 0, 1, 1], [], []>} : vector<32x64xbf16>, vector<64x32xbf16>, vector<32x32xf32> -> vector<32x32xf32>
    %c0_77 = arith.constant 0 : index
    %c0_78 = arith.constant 0 : index
    %c0_79 = arith.constant 0 : index
    %177 = vector.load %arg17[%c0_77, %c0_78, %c0_79] : memref<1x1x32xf32, #tpu.memory_space<vmem>>, vector<1x1x32xf32>
    %178 = vector.shape_cast %177 : vector<1x1x32xf32> to vector<1x32xf32>
    %179 = vector.broadcast %178 : vector<1x32xf32> to vector<32x32xf32>
    %180 = arith.addf %176, %179 : vector<32x32xf32>
    %181 = arith.addf %162, %180 : vector<32x32xf32>
    %c0_80 = arith.constant 0 : index
    %c0_81 = arith.constant 0 : index
    %c0_82 = arith.constant 0 : index
    %182 = vector.load %arg18[%c0_80, %c0_81, %c0_82] : memref<1x1x32xf32, #tpu.memory_space<vmem>>, vector<1x1x32xf32>
    %183 = vector.shape_cast %182 : vector<1x1x32xf32> to vector<1x32xf32>
    %c0_83 = arith.constant 0 : index
    %c0_84 = arith.constant 0 : index
    %c0_85 = arith.constant 0 : index
    %184 = vector.load %arg19[%c0_83, %c0_84, %c0_85] : memref<1x1x32xf32, #tpu.memory_space<vmem>>, vector<1x1x32xf32>
    %185 = vector.shape_cast %184 : vector<1x1x32xf32> to vector<1x32xf32>
    %cst_86 = arith.constant dense<0.000000e+00> : vector<32xf32>
    %186 = vector.multi_reduction <add>, %181, %cst_86 [1] : vector<32x32xf32> to vector<32xf32>
    %187 = vector.shape_cast %186 : vector<32xf32> to vector<32x1xf32>
    %cst_87 = arith.constant 3.200000e+01 : f32
    %188 = vector.broadcast %cst_87 : f32 to vector<32x1xf32>
    %189 = arith.divf %187, %188 : vector<32x1xf32>
    %190 = vector.broadcast %189 : vector<32x1xf32> to vector<32x32xf32>
    %191 = arith.subf %181, %190 : vector<32x32xf32>
    %192 = arith.mulf %191, %191 : vector<32x32xf32>
    %cst_88 = arith.constant dense<0.000000e+00> : vector<32xf32>
    %193 = vector.multi_reduction <add>, %192, %cst_88 [1] : vector<32x32xf32> to vector<32xf32>
    %194 = vector.shape_cast %193 : vector<32xf32> to vector<32x1xf32>
    %cst_89 = arith.constant 3.200000e+01 : f32
    %195 = vector.broadcast %cst_89 : f32 to vector<32x1xf32>
    %196 = arith.divf %194, %195 : vector<32x1xf32>
    %197 = vector.broadcast %189 : vector<32x1xf32> to vector<32x32xf32>
    %198 = arith.subf %181, %197 : vector<32x32xf32>
    %cst_90 = arith.constant 9.99999974E-6 : f32
    %199 = vector.broadcast %cst_90 : f32 to vector<32x1xf32>
    %200 = arith.addf %196, %199 : vector<32x1xf32>
    %201 = math.rsqrt %200 : vector<32x1xf32>
    %202 = vector.broadcast %201 : vector<32x1xf32> to vector<32x32xf32>
    %203 = arith.mulf %198, %202 : vector<32x32xf32>
    %204 = vector.broadcast %183 : vector<1x32xf32> to vector<32x32xf32>
    %205 = arith.mulf %203, %204 : vector<32x32xf32>
    %206 = vector.broadcast %185 : vector<1x32xf32> to vector<32x32xf32>
    %207 = arith.addf %205, %206 : vector<32x32xf32>
    %208 = vector.shape_cast %207 : vector<32x32xf32> to vector<2x16x32xf32>
    %c0_91 = arith.constant 0 : index
    %c0_92 = arith.constant 0 : index
    %c0_93 = arith.constant 0 : index
    %209 = vector.load %arg24[%c0_91, %c0_92, %c0_93] : memref<2x16x32xf32, #tpu.memory_space<vmem>>, vector<2x16x32xf32>
    tpu.vector_store %arg24[%c0_91, %c0_92, %c0_93], %208 {strides = array<i32>} : memref<2x16x32xf32, #tpu.memory_space<vmem>>, vector<2x16x32xf32>,
    %c1_i32 = arith.constant 1 : i32
    %210 = arith.cmpi eq, %arg0, %c1_i32 : i32
    %211 = arith.extui %210 : i1 to i32
    %c0_i32_94 = arith.constant 0 : i32
    %212 = arith.cmpi ne, %211, %c0_i32_94 : i32
    scf.if %212 {
      %213 = vector.shape_cast %207 : vector<32x32xf32> to vector<2x16x32xf32>
      %c0_95 = arith.constant 0 : index
      %c0_96 = arith.constant 0 : index
      %c0_97 = arith.constant 0 : index
      %214 = vector.load %arg22[%c0_95, %c0_96, %c0_97] : memref<2x16x32xf32, #tpu.memory_space<vmem>>, vector<2x16x32xf32>
      tpu.vector_store %arg22[%c0_95, %c0_96, %c0_97], %213 {strides = array<i32>} : memref<2x16x32xf32, #tpu.memory_space<vmem>>, vector<2x16x32xf32>,
      %215 = vector.extract_strided_slice %213 {offsets = [0, 0, 0], sizes = [2, 1, 32], strides = [1, 1, 1]} : vector<2x16x32xf32> to vector<2x1x32xf32>
      %216 = vector.shape_cast %215 : vector<2x1x32xf32> to vector<2x32xf32>
      %c0_98 = arith.constant 0 : index
      %c0_99 = arith.constant 0 : index
      %217 = vector.load %arg20[%c0_98, %c0_99] : memref<32x32xf32, #tpu.memory_space<vmem>>, vector<32x32xf32>
      %cst_100 = arith.constant dense<0.000000e+00> : vector<2x32xf32>
      %218 = tpu.matmul %216, %217, %cst_100 {dimension_numbers = #tpu.dot_dimension_numbers<[1], [0], [0], [1], [0, 0, 1, 1], [], []>} : vector<2x32xf32>, vector<32x32xf32>, vector<2x32xf32> -> vector<2x32xf32>
      %c0_101 = arith.constant 0 : index
      %c0_102 = arith.constant 0 : index
      %219 = vector.load %arg21[%c0_101, %c0_102] : memref<1x32xf32, #tpu.memory_space<vmem>>, vector<1x32xf32>
      %220 = vector.broadcast %219 : vector<1x32xf32> to vector<2x32xf32>
      %221 = arith.addf %218, %220 : vector<2x32xf32>
      %c0_103 = arith.constant 0 : index
      %c0_104 = arith.constant 0 : index
      %222 = vector.load %arg23[%c0_103, %c0_104] : memref<2x32xf32, #tpu.memory_space<vmem>>, vector<2x32xf32>
      tpu.vector_store %arg23[%c0_103, %c0_104], %221 {strides = array<i32>} : memref<2x32xf32, #tpu.memory_space<vmem>>, vector<2x32xf32>,
    } else {
    }
    return
  }
  func.func @transform_0(%arg0: i32) -> (i32, i32, i32) {
    %c0_i32 = arith.constant 0 : i32
    %c0_i32_0 = arith.constant 0 : i32
    %c0_i32_1 = arith.constant 0 : i32
    %c0_i32_2 = arith.constant 0 : i32
    return %c0_i32, %c0_i32_0, %c0_i32_1 : i32, i32, i32
  }
  func.func @transform_1(%arg0: i32) -> (i32, i32) {
    %c0_i32 = arith.constant 0 : i32
    %c0_i32_0 = arith.constant 0 : i32
    %c0_i32_1 = arith.constant 0 : i32
    return %c0_i32, %c0_i32_0 : i32, i32
  }
  func.func @transform_2(%arg0: i32) -> (i32, i32) {
    %c0_i32 = arith.constant 0 : i32
    %c0_i32_0 = arith.constant 0 : i32
    %c0_i32_1 = arith.constant 0 : i32
    return %c0_i32, %c0_i32_0 : i32, i32
  }
  func.func @transform_3(%arg0: i32) -> (i32, i32, i32) {
    %c0_i32 = arith.constant 0 : i32
    %c0_i32_0 = arith.constant 0 : i32
    %c0_i32_1 = arith.constant 0 : i32
    return %arg0, %c0_i32, %c0_i32_0 : i32, i32, i32
  }
  func.func @transform_4(%arg0: i32) -> (i32, i32, i32) {
    %c0_i32 = arith.constant 0 : i32
    %c0_i32_0 = arith.constant 0 : i32
    %c0_i32_1 = arith.constant 0 : i32
    return %arg0, %c0_i32, %c0_i32_0 : i32, i32, i32
  }
  func.func @transform_5(%arg0: i32) -> (i32, i32, i32) {
    %c0_i32 = arith.constant 0 : i32
    %c0_i32_0 = arith.constant 0 : i32
    %c0_i32_1 = arith.constant 0 : i32
    return %arg0, %c0_i32, %c0_i32_0 : i32, i32, i32
  }
  func.func @transform_6(%arg0: i32) -> (i32, i32, i32) {
    %c0_i32 = arith.constant 0 : i32
    %c0_i32_0 = arith.constant 0 : i32
    %c0_i32_1 = arith.constant 0 : i32
    return %arg0, %c0_i32, %c0_i32_0 : i32, i32, i32
  }
  func.func @transform_7(%arg0: i32) -> (i32, i32, i32) {
    %c0_i32 = arith.constant 0 : i32
    %c0_i32_0 = arith.constant 0 : i32
    %c0_i32_1 = arith.constant 0 : i32
    return %arg0, %c0_i32, %c0_i32_0 : i32, i32, i32
  }
  func.func @transform_8(%arg0: i32) -> (i32, i32, i32) {
    %c0_i32 = arith.constant 0 : i32
    %c0_i32_0 = arith.constant 0 : i32
    %c0_i32_1 = arith.constant 0 : i32
    return %arg0, %c0_i32, %c0_i32_0 : i32, i32, i32
  }
  func.func @transform_9(%arg0: i32) -> (i32, i32, i32) {
    %c0_i32 = arith.constant 0 : i32
    %c0_i32_0 = arith.constant 0 : i32
    %c0_i32_1 = arith.constant 0 : i32
    return %arg0, %c0_i32, %c0_i32_0 : i32, i32, i32
  }
  func.func @transform_10(%arg0: i32) -> (i32, i32, i32) {
    %c0_i32 = arith.constant 0 : i32
    %c0_i32_0 = arith.constant 0 : i32
    %c0_i32_1 = arith.constant 0 : i32
    return %arg0, %c0_i32, %c0_i32_0 : i32, i32, i32
  }
  func.func @transform_11(%arg0: i32) -> (i32, i32, i32) {
    %c0_i32 = arith.constant 0 : i32
    %c0_i32_0 = arith.constant 0 : i32
    %c0_i32_1 = arith.constant 0 : i32
    return %arg0, %c0_i32, %c0_i32_0 : i32, i32, i32
  }
  func.func @transform_12(%arg0: i32) -> (i32, i32, i32) {
    %c0_i32 = arith.constant 0 : i32
    %c0_i32_0 = arith.constant 0 : i32
    %c0_i32_1 = arith.constant 0 : i32
    return %arg0, %c0_i32, %c0_i32_0 : i32, i32, i32
  }
  func.func @transform_13(%arg0: i32) -> (i32, i32, i32) {
    %c0_i32 = arith.constant 0 : i32
    %c0_i32_0 = arith.constant 0 : i32
    %c0_i32_1 = arith.constant 0 : i32
    return %arg0, %c0_i32, %c0_i32_0 : i32, i32, i32
  }
  func.func @transform_14(%arg0: i32) -> (i32, i32, i32) {
    %c0_i32 = arith.constant 0 : i32
    %c0_i32_0 = arith.constant 0 : i32
    %c0_i32_1 = arith.constant 0 : i32
    return %arg0, %c0_i32, %c0_i32_0 : i32, i32, i32
  }
  func.func @transform_15(%arg0: i32) -> (i32, i32, i32) {
    %c0_i32 = arith.constant 0 : i32
    %c0_i32_0 = arith.constant 0 : i32
    %c0_i32_1 = arith.constant 0 : i32
    return %arg0, %c0_i32, %c0_i32_0 : i32, i32, i32
  }
  func.func @transform_16(%arg0: i32) -> (i32, i32, i32) {
    %c0_i32 = arith.constant 0 : i32
    %c0_i32_0 = arith.constant 0 : i32
    %c0_i32_1 = arith.constant 0 : i32
    return %arg0, %c0_i32, %c0_i32_0 : i32, i32, i32
  }
  func.func @transform_17(%arg0: i32) -> (i32, i32, i32) {
    %c0_i32 = arith.constant 0 : i32
    %c0_i32_0 = arith.constant 0 : i32
    %c0_i32_1 = arith.constant 0 : i32
    return %arg0, %c0_i32, %c0_i32_0 : i32, i32, i32
  }
  func.func @transform_18(%arg0: i32) -> (i32, i32, i32) {
    %c0_i32 = arith.constant 0 : i32
    %c0_i32_0 = arith.constant 0 : i32
    %c0_i32_1 = arith.constant 0 : i32
    return %arg0, %c0_i32, %c0_i32_0 : i32, i32, i32
  }
  func.func @transform_19(%arg0: i32) -> (i32, i32) {
    %c0_i32 = arith.constant 0 : i32
    %c0_i32_0 = arith.constant 0 : i32
    %c0_i32_1 = arith.constant 0 : i32
    return %c0_i32, %c0_i32_0 : i32, i32
  }
  func.func @transform_20(%arg0: i32) -> (i32, i32) {
    %c0_i32 = arith.constant 0 : i32
    %c0_i32_0 = arith.constant 0 : i32
    %c0_i32_1 = arith.constant 0 : i32
    return %c0_i32, %c0_i32_0 : i32, i32
  }
  func.func @transform_21(%arg0: i32) -> (i32, i32, i32) {
    %c0_i32 = arith.constant 0 : i32
    %c0_i32_0 = arith.constant 0 : i32
    %c0_i32_1 = arith.constant 0 : i32
    %c0_i32_2 = arith.constant 0 : i32
    return %c0_i32, %c0_i32_0, %c0_i32_1 : i32, i32, i32
  }
  func.func @transform_22(%arg0: i32) -> (i32, i32) {
    %c0_i32 = arith.constant 0 : i32
    %c0_i32_0 = arith.constant 0 : i32
    %c0_i32_1 = arith.constant 0 : i32
    return %c0_i32, %c0_i32_0 : i32, i32
  }
}

</mosaic_0001>

<bundles_post_ra>
// kernel: spectra_encoder.1
= control target key start
LH: loop header
LB: loop body
LE: loop exit
PB: predicated region body
PF: predicated region fallthrough
CT: control target
= control target key end

     0   :  { %s5922_s0 = inlined_call_operand.vmem [shape: f32[2,16,8], index: 0, kind: input, shape index: {}]   ;;  %s5923_s1 = inlined_call_operand.vmem [shape: f32[8,32], index: 1, kind: input, shape index: {}]   ;;  %s5924_s2 = inlined_call_operand.vmem [shape: f32[16,32], index: 2, kind: input, shape index: {}]   ;;  %s5925_s3 = inlined_call_operand.vmem [shape: bf16[2,32,32], index: 3, kind: input, shape index: {}]   ;;  %s5926_s4 = inlined_call_operand.vmem [shape: bf16[2,32,32], index: 4, kind: input, shape index: {}]   ;;  %s5927_s5 = inlined_call_operand.vmem [shape: bf16[2,32,32], index: 5, kind: input, shape index: {}]   ;;  %s5928_s6 = inlined_call_operand.vmem [shape: f32[2,1,32], index: 6, kind: input, shape index: {}]   ;;  %s5929_s7 = inlined_call_operand.hbm [shape: f32[2,1,32], index: 7, kind: input, shape index: {}]   ;;  %s5930_s8 = inlined_call_operand.hbm [shape: f32[2,1,32], index: 8, kind: input, shape index: {}]   ;;  %s5931_s9 = inlined_call_operand.vmem [shape: bf16[2,32,32], index: 9, kind: input, shape index: {}]   ;;  %s5932_s10 = inlined_call_operand.hbm [shape: f32[2,1,32], index: 10, kind: input, shape index: {}]   ;;  %s5933_s11 = inlined_call_operand.vmem [shape: f32[2,1,32], index: 11, kind: input, shape index: {}]   ;;  %s5934_s12 = inlined_call_operand.hbm [shape: f32[2,1,32], index: 12, kind: input, shape index: {}]   ;;  %s5935_s13 = inlined_call_operand.vmem [shape: bf16[2,32,64], index: 13, kind: input, shape index: {}]   ;;  %s5936_s14 = inlined_call_operand.hbm [shape: f32[2,1,64], index: 14, kind: input, shape index: {}]   ;;  %s5937_s15 = inlined_call_operand.vmem [shape: bf16[2,64,32], index: 15, kind: input, shape index: {}]   ;;  %s5938_s16 = inlined_call_operand.hbm [shape: f32[2,1,32], index: 16, kind: input, shape index: {}]   ;;  %s5939_s17 = inlined_call_operand.vmem [shape: f32[2,1,32], index: 17, kind: input, shape index: {}]   ;;  %s5940_s18 = inlined_call_operand.hbm [shape: f32[2,1,32], index: 18, kind: input, shape index: {}]   ;;  %s5941_s19 = inlined_call_operand.vmem [shape: f32[32,32], index: 19, kind: input, shape index: {}]   ;;  %s5942_s20 = inlined_call_operand.vmem [shape: f32[1,32], index: 20, kind: input, shape index: {}]   ;;  %s5943_s21 = inlined_call_operand.vmem [shape: f32[2,16,32], index: 21, kind: output, shape index: {0}]   ;;  %s5944_s22 = inlined_call_operand.hbm [shape: f32[2,32], index: 22, kind: output, shape index: {1}]  }
   0x1   :  { %5956 = sst [smem:[#allocation24_spill]] %s5922_s0 }
   0x2   :  { %5957 = sst [smem:[#allocation25_spill]] %s5923_s1 }
   0x3   :  { %5958 = sst [smem:[#allocation26_spill]] %s5924_s2 }
   0x4   :  { %5959 = sst [smem:[#allocation27_spill]] %s5925_s3 }
   0x5   :  { %5960 = sst [smem:[#allocation28_spill]] %s5926_s4 }
   0x6   :  { %5961 = sst [smem:[#allocation29_spill]] %s5927_s5 }
   0x7   :  { %5962 = sst [smem:[#allocation30_spill]] %s5928_s6 }
   0x8   :  { %5963 = sst [smem:[#allocation31_spill]] %s5929_s7 }
   0x9   :  { %5964 = sst [smem:[#allocation32_spill]] %s5930_s8 }
   0xa   :  { %5965 = sst [smem:[#allocation33_spill]] %s5932_s10 }
   0xb   :  { %5966 = sst [smem:[#allocation34_spill]] %s5934_s12 }
   0xc   :  { %5967 = sst [smem:[#allocation35_spill]] %s5941_s19 }
   0xd   :  { %5968 = sst [smem:[#allocation36_spill]] %s5942_s20 }
   0xe   :  { %5969 = sst [smem:[#allocation37_spill]] %s5943_s21 }
   0xf   :  { %5970 = sst [smem:[#allocation38_spill]] %s5944_s22 }
  0x10   :  { %28 = vsyncpa [#allocation4], 0 }
  0x11   :  { %30 = vsyncpa [#allocation4 + $0x1], 0 }
  0x12   :  { %31 = vsyncpa [#allocation7], 0 }
  0x13   :  { %33 = vsyncpa [#allocation7 + $0x1], 0 }
  0x14   :  { %34 = vsyncpa [#allocation10], 0 }
  0x15   :  { %36 = vsyncpa [#allocation10 + $0x1], 0 }
  0x16   :  { %37 = vsyncpa [#allocation13], 0 }
  0x17   :  { %39 = vsyncpa [#allocation13 + $0x1], 0 }
  0x18   :  { %40 = vsyncpa [#allocation5], 0  ;;  %s5167_s3 = smov 0   ;;  %s5169_s28 = smov 0  }
  0x19   :  { %s5171_s29 = smov 0   ;;  %s5173_s30 = smov 0  }
  0x1a LB: > { %5971 = sst [smem:[#allocation21_spill]] %s5032_s29  ;;  %s5186_s4 = sadd.s32 4294967295, %s5036_s30   ;;  %s5036_s30 = sphi %s5173_s30, %s6020_s30   ;;  %s5032_s29 = sphi %s5171_s29, %s6022_s29   ;;  %s5028_s28 = sphi %s5169_s28, %s6024_s28   ;;  %s5024_s3 = sphi %s5167_s3, %s6023_s3  }
  0x1b   : > { %s5189_s0 = sadd.s32 1, %s5036_s30   ;;  %s220_s1 = sadd.s32 1, %s5032_s29 }
  0x1c   : > { %5972 = sst [smem:[#allocation22_spill]] %s5189_s0  ;;  %s217_s23 = ssub.s32 %s5036_s30, %s5189_s0 }
  0x1d   : > { %p218_p0 = scmp.eq.s32.totalorder %s217_s23, 0  ;;  %p227_p1 = scmp.ne.s32.totalorder %s5032_s29, %s5028_s28 }
  0x1e   : > { %p228_p2 = scmp.eq.s32.totalorder %s5036_s30, 0  ;;  %p233_p3 = scmp.ne.s32.totalorder %s5028_s28, %s5024_s3 }
  0x1f   : > { %s5199_s5 = scalar_select %p218_p0, %s5032_s29, %s220_s1  }
  0x20   : > { %p229_p4 = por %p228_p2, %p227_p1  ;;  %p234_p5 = scmp.eq.s32.totalorder %s5186_s4, 0 }
  0x21   : > { %5973 = sst [smem:[#allocation23_spill]] %s5199_s5  ;;  %p4552_p6 = scmp.lt.s32.totalorder %s5036_s30, 2 }
  0x22   : > { %p5203_p7 = por %p234_p5, %p233_p3  ;;  %s5208_s6 = sand.u32 1, %s5032_s29  }
  0x23   : > { %s5211_s25 = sshll.u32 %s5036_s30, 4  ;;  %p5213_p8 = pnand %p4552_p6, %p229_p4 }
  0x24   : > { %s5974_s24 = scalar_select %p5203_p7, 1, 0 }
  0x25   : > { %s5975_s26 = scalar_select %p5213_p8, 1, 0 }
  0x26   : > { %s5218_s2 = sand.u32 1, %s5036_s30   ;;  %s5976_s8 = sld [smem:[#allocation32_spill]] }
  0x27   : > { %s692_s1 = scalar_lea.vmem [#allocation6], %s5208_s6  ;;  %p5235_p11 = pneg %p5213_p8 }
  0x28   : > { %s699_s5 = sshll.u32 %s692_s1, 4  ;;  %s5227_s5 = int_to_ptr.vmem [resolvable:$true] %s699_s5 }
  0x2c   : > { %s5224_s23 = scalar_lea.hbm %s5976_s8, %s5211_s25  ;;  %s4755_s20 = scalar_lea.hbm %s5976_s8, 32 }
  0x2d   : > { %s4750_s0 = scalar_lea.hbm %s5224_s23, 16  ;;  %p4756_p0 = scmp.lt.u32.totalorder %s5224_s23, %s5976_s8 }
  0x2e   : > { %p4751_p10 = scmp.ne.s32.totalorder %s5224_s23, %s4750_s0  ;;  %p4757_p1 = scmp.lt.u32.totalorder %s4755_s20, %s4750_s0 }
  0x2f   : > { %p4759_p3 = scmp.lt.u32.totalorder %s4750_s0, %s5224_s23 }
  0x30   : > { %p4753_p12 = pnand %p5235_p11, %p4751_p10  ;;  %p4758_p2 = por %p4757_p1, %p4756_p0 }
  0x32   : > { %p4754_p13 = pneg %p4753_p12  ;;  %p4760_p4 = por %p4759_p3, %p4758_p2 }
  0x34   : > { %p4761_p5 = pnand %p4760_p4, %p4754_p13 }
  0x36   : > { %4764 = shalt.err (!%p4761_p5)
}
  0x37   : > { %s4765_s29 = scalar_lea.vmem %s5227_s5, 16  ;;  %s5038_s27 = smov [#allocation6]  }
  0x38   : > { %p4766_p6 = scmp.ne.s32.totalorder %s5227_s5, %s4765_s29  ;;  %s4770_s3 = sshll.u32 %s5038_s27, 4  ;;  %s4771_s3 = int_to_ptr.vmem [resolvable:$false] %s4770_s3 }
  0x39   : > { %s4772_s19 = scalar_lea.vmem %s4771_s3, 32  ;;  %p4773_p9 = scmp.lt.s32.totalorder %s5227_s5, %s4771_s3 }
  0x3a   : > { %p4768_p10 = pnand %p4766_p6, %p5235_p11  ;;  %p4774_p7 = scmp.lt.s32.totalorder %s4772_s19, %s4765_s29 }
  0x3c   : > { %p4769_p12 = pneg %p4768_p10  ;;  %p4775_p0 = por %p4774_p7, %p4773_p9 }
  0x3e   : > { %p4776_p1 = pnand %p4775_p0, %p4769_p12 }
  0x40   : > { %4779 = shalt.err (!%p4776_p1)
}
  0x41   : > { %s5978_s20 = scalar_lea.sflag [#allocation7], %s5218_s2  ;;  %p825_p13 = scmp.lt.s32.totalorder %s5036_s30, 3 }
  0x42   : > { %4536 = dma.hbm_to_vmem [thread:$0]  (!%p5213_p8), %s5224_s23, 16, %s5227_s5, %s5978_s20  }
  0x43   : > { %s5979_s12 = sld [smem:[#allocation34_spill]]  ;;  %p5980_p7 = scmp.ge.s32.totalorder %s5036_s30, 1 }
  0x44   : > { %s740_s3 = scalar_lea.vmem [#allocation9], %s5208_s6 }
  0x45   : > { %p5269_p9 = pnand %p5980_p7, %p825_p13  ;;  %s747_s19 = sshll.u32 %s740_s3, 4  ;;  %s748_s19 = int_to_ptr.vmem [resolvable:$true] %s747_s19 }
  0x47   : > { %s5981_s27 = scalar_select %p5269_p9, 1, 0 }
  0x49   : > { %s5265_s29 = scalar_lea.hbm %s5979_s12, %s5211_s25  ;;  %s4785_s30 = scalar_lea.hbm %s5979_s12, 32 }
  0x4a   : > { %s4780_s5 = scalar_lea.hbm %s5265_s29, 16  ;;  %p4786_p5 = scmp.lt.u32.totalorder %s5265_s29, %s5979_s12 }
  0x4b   : > { %p4781_p2 = scmp.ne.s32.totalorder %s5265_s29, %s4780_s5  ;;  %p4787_p6 = scmp.lt.u32.totalorder %s4785_s30, %s4780_s5 }
  0x4c   : > { %p4789_p12 = scmp.lt.u32.totalorder %s4780_s5, %s5265_s29 }
  0x4d   : > { %p4783_p3 = pnand %p4781_p2, %p5235_p11  ;;  %p4788_p10 = por %p4787_p6, %p4786_p5 }
  0x4f   : > { %p4784_p4 = pneg %p4783_p3  ;;  %p4790_p0 = por %p4789_p12, %p4788_p10 }
  0x51   : > { %p4791_p1 = pnand %p4790_p0, %p4784_p4 }
  0x53   : > { %4794 = shalt.err (!%p4791_p1)
}
  0x54   : > { %s4795_s3 = scalar_lea.vmem %s748_s19, 16  ;;  %s5039_s8 = smov [#allocation9]  }
  0x55   : > { %p4796_p13 = scmp.ne.s32.totalorder %s748_s19, %s4795_s3  ;;  %s4800_s21 = sshll.u32 %s5039_s8, 4  ;;  %s4801_s21 = int_to_ptr.vmem [resolvable:$false] %s4800_s21 }
  0x56   : > { %s4802_s23 = scalar_lea.vmem %s4801_s21, 32  ;;  %p4803_p3 = scmp.lt.s32.totalorder %s748_s19, %s4801_s21 }
  0x57   : > { %p4798_p7 = pnand %p4796_p13, %p5235_p11  ;;  %p4804_p9 = scmp.lt.s32.totalorder %s4802_s23, %s4795_s3 }
  0x59   : > { %p4799_p2 = pneg %p4798_p7  ;;  %p4805_p8 = por %p4804_p9, %p4803_p3 }
  0x5b   : > { %p4806_p5 = pnand %p4805_p8, %p4799_p2 }
  0x5d   : > { %4809 = shalt.err (!%p4806_p5)
}
  0x5e   : > { %p5982_p6 = scmp.ne.s32.totalorder %s5975_s26, 0  ;;  %s5983_s5 = scalar_lea.sflag [#allocation10], %s5218_s2 }
  0x5f   : > { %s5298_s8 = scalar_lea.hbm %s5938_s16, %s5211_s25  ;;  %s790_s21 = scalar_lea.vmem [#allocation12], %s5208_s6 }
  0x60   : > { %4542 = dma.hbm_to_vmem [thread:$0]  (!%p5982_p6), %s5265_s29, 16, %s748_s19, %s5983_s5  }
  0x61   : > { %s797_s0 = sshll.u32 %s790_s21, 4  ;;  %s4810_s3 = scalar_lea.hbm %s5298_s8, 16  ;;  %s798_s0 = int_to_ptr.vmem [resolvable:$true] %s797_s0 }
  0x62   : > { %p4811_p8 = scmp.ne.s32.totalorder %s5298_s8, %s4810_s3  ;;  %s4815_s19 = scalar_lea.hbm %s5938_s16, 32 }
  0x63   : > { %p4816_p10 = scmp.lt.u32.totalorder %s5298_s8, %s5938_s16  ;;  %p4817_p12 = scmp.lt.u32.totalorder %s4815_s19, %s4810_s3 }
  0x64   : > { %p4813_p9 = pnand %p4811_p8, %p5235_p11  ;;  %p4819_p1 = scmp.lt.u32.totalorder %s4810_s3, %s5298_s8 }
  0x65   : > { %p4818_p0 = por %p4817_p12, %p4816_p10 }
  0x66   : > { %p4814_p4 = pneg %p4813_p9 }
  0x67   : > { %p4820_p13 = por %p4819_p1, %p4818_p0 }
  0x69   : > { %p4821_p7 = pnand %p4820_p13, %p4814_p4 }
  0x6b   : > { %4824 = shalt.err (!%p4821_p7)
}
  0x6c   : > { %s4825_s30 = scalar_lea.vmem %s798_s0, 16  ;;  %s5040_s21 = smov [#allocation12]  }
  0x6d   : > { %p4826_p2 = scmp.ne.s32.totalorder %s798_s0, %s4825_s30  ;;  %s4830_s1 = sshll.u32 %s5040_s21, 4  ;;  %s4831_s1 = int_to_ptr.vmem [resolvable:$false] %s4830_s1 }
  0x6e   : > { %s4832_s23 = scalar_lea.vmem %s4831_s1, 32  ;;  %p4833_p8 = scmp.lt.s32.totalorder %s798_s0, %s4831_s1 }
  0x6f   : > { %p4828_p3 = pnand %p4826_p2, %p5235_p11  ;;  %p4834_p9 = scmp.lt.s32.totalorder %s4832_s23, %s4825_s30 }
  0x71   : > { %p4829_p5 = pneg %p4828_p3  ;;  %p4835_p6 = por %p4834_p9, %p4833_p8 }
  0x73   : > { %p4836_p10 = pnand %p4835_p6, %p4829_p5 }
  0x75   : > { %4839 = shalt.err (!%p4836_p10)
}
  0x76   : > { %p5984_p12 = scmp.ne.s32.totalorder %s5975_s26, 0  ;;  %s5985_s3 = scalar_lea.sflag [#allocation13], %s5218_s2 }
  0x77   : > { %s5986_s7 = sld [smem:[#allocation31_spill]]  ;;  %s675_s1 = scalar_lea.vmem [#allocation3], %s5208_s6 }
  0x78   : > { %4548 = dma.hbm_to_vmem [thread:$0]  (!%p5984_p12), %s5298_s8, 16, %s798_s0, %s5985_s3  }
  0x79   : > { %s682_s20 = sshll.u32 %s675_s1, 4  ;;  %s673_s30 = scalar_lea.sflag [#allocation4], %s5208_s6  ;;  %s683_s20 = int_to_ptr.vmem [resolvable:$true] %s682_s20 }
  0x7d   : > { %s5325_s5 = scalar_lea.hbm %s5986_s7, %s5211_s25  ;;  %s4845_s0 = scalar_lea.hbm %s5986_s7, 32 }
  0x7e   : > { %s4840_s21 = scalar_lea.hbm %s5325_s5, 16  ;;  %p4846_p1 = scmp.lt.u32.totalorder %s5325_s5, %s5986_s7 }
  0x7f   : > { %p4841_p6 = scmp.ne.s32.totalorder %s5325_s5, %s4840_s21  ;;  %p4847_p13 = scmp.lt.u32.totalorder %s4845_s0, %s4840_s21 }
  0x80   : > { %p4849_p2 = scmp.lt.u32.totalorder %s4840_s21, %s5325_s5 }
  0x81   : > { %p4843_p4 = pnand %p4841_p6, %p5235_p11  ;;  %p4848_p7 = por %p4847_p13, %p4846_p1 }
  0x83   : > { %p4844_p0 = pneg %p4843_p4  ;;  %p4850_p3 = por %p4849_p2, %p4848_p7 }
  0x85   : > { %p4851_p5 = pnand %p4850_p3, %p4844_p0 }
  0x87   : > { %4854 = shalt.err (!%p4851_p5)
}
  0x88   : > { %s4855_s19 = scalar_lea.vmem %s683_s20, 16  ;;  %s5041_s1 = smov [#allocation3]  }
  0x89   : > { %p4856_p8 = scmp.ne.s32.totalorder %s683_s20, %s4855_s19  ;;  %s4860_s12 = sshll.u32 %s5041_s1, 4  ;;  %s4861_s12 = int_to_ptr.vmem [resolvable:$false] %s4860_s12 }
  0x8a   : > { %s4862_s23 = scalar_lea.vmem %s4861_s12, 32  ;;  %p4863_p6 = scmp.lt.s32.totalorder %s683_s20, %s4861_s12 }
  0x8b   : > { %p4858_p9 = pnand %p4856_p8, %p5235_p11  ;;  %p4864_p4 = scmp.lt.s32.totalorder %s4862_s23, %s4855_s19 }
  0x8d   : > { %p4859_p10 = pneg %p4858_p9  ;;  %p4865_p12 = por %p4864_p4, %p4863_p6 }
  0x8f   : > { %p4866_p1 = pnand %p4865_p12, %p4859_p10 }
  0x91   : > { %4869 = shalt.err (!%p4866_p1)
}
  0x92   : > { %p5987_p13 = scmp.ne.s32.totalorder %s5975_s26, 0  ;;  %s5988_s10 = sld [smem:[#allocation33_spill]] }
  0x93   : > { %s717_s12 = scalar_lea.vmem [#allocation8], %s5208_s6 }
  0x94   : > { %4533 = dma.hbm_to_vmem [thread:$0]  (!%p5987_p13), %s5325_s5, 16, %s683_s20, %s673_s30  }
  0x95   : > { %s724_s3 = sshll.u32 %s717_s12, 4  ;;  %s725_s3 = int_to_ptr.vmem [resolvable:$true] %s724_s3 }
  0x98   : > { %s5350_s0 = scalar_lea.hbm %s5988_s10, %s5211_s25  ;;  %s4875_s5 = scalar_lea.hbm %s5988_s10, 32 }
  0x99   : > { %s4870_s29 = scalar_lea.hbm %s5350_s0, 16  ;;  %p4876_p2 = scmp.lt.u32.totalorder %s5350_s0, %s5988_s10 }
  0x9a   : > { %p4871_p12 = scmp.ne.s32.totalorder %s5350_s0, %s4870_s29  ;;  %p4877_p3 = scmp.lt.u32.totalorder %s4875_s5, %s4870_s29 }
  0x9b   : > { %p4879_p8 = scmp.lt.u32.totalorder %s4870_s29, %s5350_s0 }
  0x9c   : > { %p4873_p0 = pnand %p4871_p12, %p5235_p11  ;;  %p4878_p5 = por %p4877_p3, %p4876_p2 }
  0x9e   : > { %p4874_p7 = pneg %p4873_p0  ;;  %p4880_p9 = por %p4879_p8, %p4878_p5 }
  0xa0   : > { %p4881_p10 = pnand %p4880_p9, %p4874_p7 }
  0xa2   : > { %4884 = shalt.err (!%p4881_p10)
}
  0xa3   : > { %s4885_s23 = scalar_lea.vmem %s725_s3, 16  ;;  %s5042_s21 = smov [#allocation8]  }
  0xa4   : > { %p4886_p6 = scmp.ne.s32.totalorder %s725_s3, %s4885_s23  ;;  %s4890_s8 = sshll.u32 %s5042_s21, 4  ;;  %s4891_s8 = int_to_ptr.vmem [resolvable:$false] %s4890_s8 }
  0xa5   : > { %s4892_s12 = scalar_lea.vmem %s4891_s8, 32  ;;  %p4893_p12 = scmp.lt.s32.totalorder %s725_s3, %s4891_s8 }
  0xa6   : > { %p4888_p4 = pnand %p4886_p6, %p5235_p11  ;;  %p4894_p0 = scmp.lt.s32.totalorder %s4892_s12, %s4885_s23 }
  0xa8   : > { %p4889_p1 = pneg %p4888_p4  ;;  %p4895_p13 = por %p4894_p0, %p4893_p12 }
  0xaa   : > { %p4896_p2 = pnand %p4895_p13, %p4889_p1 }
  0xac   : > { %4899 = shalt.err (!%p4896_p2)
}
  0xad   : > { %p5989_p3 = scmp.ne.s32.totalorder %s5975_s26, 0  ;;  %s5990_s29 = scalar_lea.sflag [#allocation7], %s5218_s2 }
  0xae   : > { %s5376_s5 = scalar_lea.hbm %s5936_s14, %s5211_s25  ;;  %s765_s20 = scalar_lea.vmem [#allocation11], %s5208_s6 }
  0xaf   : > { %4539 = dma.hbm_to_vmem [thread:$0]  (!%p5989_p3), %s5350_s0, 16, %s725_s3, %s5990_s29  }
  0xb0   : > { %s772_s30 = sshll.u32 %s765_s20, 4  ;;  %s4900_s23 = scalar_lea.hbm %s5376_s5, 16  ;;  %s773_s30 = int_to_ptr.vmem [resolvable:$true] %s772_s30 }
  0xb1   : > { %p4901_p13 = scmp.ne.s32.totalorder %s5376_s5, %s4900_s23  ;;  %s4905_s0 = scalar_lea.hbm %s5936_s14, 32 }
  0xb2   : > { %p4906_p8 = scmp.lt.u32.totalorder %s5376_s5, %s5936_s14  ;;  %p4907_p9 = scmp.lt.u32.totalorder %s4905_s0, %s4900_s23 }
  0xb3   : > { %p4903_p7 = pnand %p4901_p13, %p5235_p11  ;;  %p4909_p6 = scmp.lt.u32.totalorder %s4900_s23, %s5376_s5 }
  0xb4   : > { %p4908_p10 = por %p4907_p9, %p4906_p8 }
  0xb5   : > { %p4904_p5 = pneg %p4903_p7 }
  0xb6   : > { %p4910_p4 = por %p4909_p6, %p4908_p10 }
  0xb8   : > { %p4911_p1 = pnand %p4910_p4, %p4904_p5 }
  0xba   : > { %4914 = shalt.err (!%p4911_p1)
}
  0xbb   : > { %s4915_s29 = scalar_lea.vmem %s773_s30, 16  ;;  %s5043_s19 = smov [#allocation11]  }
  0xbc   : > { %p4916_p12 = scmp.ne.s32.totalorder %s773_s30, %s4915_s29  ;;  %s4920_s1 = sshll.u32 %s5043_s19, 4  ;;  %s4921_s1 = int_to_ptr.vmem [resolvable:$false] %s4920_s1 }
  0xbd   : > { %s4922_s20 = scalar_lea.vmem %s4921_s1, 32  ;;  %p4923_p13 = scmp.lt.s32.totalorder %s773_s30, %s4921_s1 }
  0xbe   : > { %p4918_p0 = pnand %p4916_p12, %p5235_p11  ;;  %p4924_p7 = scmp.lt.s32.totalorder %s4922_s20, %s4915_s29 }
  0xc0   : > { %p4919_p2 = pneg %p4918_p0  ;;  %p4925_p3 = por %p4924_p7, %p4923_p13 }
  0xc2   : > { %p4926_p8 = pnand %p4925_p3, %p4919_p2 }
  0xc4   : > { %4929 = shalt.err (!%p4926_p8)
}
  0xc5   : > { %p5991_p9 = scmp.ne.s32.totalorder %s5975_s26, 0  ;;  %s5992_s23 = scalar_lea.sflag [#allocation10], %s5218_s2 }
  0xc6   : > { %s5402_s0 = scalar_lea.hbm %s5940_s18, %s5211_s25  ;;  %s813_s3 = scalar_lea.vmem [#allocation14], %s5208_s6 }
  0xc7   : > { %4545 = dma.hbm_to_vmem [thread:$0]  (!%p5991_p9), %s5376_s5, 16, %s773_s30, %s5992_s23  }
  0xc8   : > { %s820_s12 = sshll.u32 %s813_s3, 4  ;;  %s4930_s29 = scalar_lea.hbm %s5402_s0, 16  ;;  %s821_s12 = int_to_ptr.vmem [resolvable:$true] %s820_s12 }
  0xc9   : > { %p4931_p3 = scmp.ne.s32.totalorder %s5402_s0, %s4930_s29  ;;  %s4935_s5 = scalar_lea.hbm %s5940_s18, 32 }
  0xca   : > { %p4936_p6 = scmp.lt.u32.totalorder %s5402_s0, %s5940_s18  ;;  %p4937_p4 = scmp.lt.u32.totalorder %s4935_s5, %s4930_s29 }
  0xcb   : > { %p4933_p5 = pnand %p4931_p3, %p5235_p11  ;;  %p4939_p12 = scmp.lt.u32.totalorder %s4930_s29, %s5402_s0 }
  0xcc   : > { %p4938_p1 = por %p4937_p4, %p4936_p6 }
  0xcd   : > { %p4934_p10 = pneg %p4933_p5 }
  0xce   : > { %p4940_p0 = por %p4939_p12, %p4938_p1 }
  0xd0   : > { %p4941_p2 = pnand %p4940_p0, %p4934_p10 }
  0xd2   : > { %4944 = shalt.err (!%p4941_p2)
}
  0xd3   : > { %s4945_s6 = scalar_lea.vmem %s821_s12, 16  ;;  %s5044_s25 = smov [#allocation14]  }
  0xd4   : > { %p4946_p13 = scmp.ne.s32.totalorder %s821_s12, %s4945_s6  ;;  %s4950_s23 = sshll.u32 %s5044_s25, 4  ;;  %s4951_s23 = int_to_ptr.vmem [resolvable:$false] %s4950_s23 }
  0xd5   : > { %s4952_s21 = scalar_lea.vmem %s4951_s23, 32  ;;  %p4953_p3 = scmp.lt.s32.totalorder %s821_s12, %s4951_s23 }
  0xd6   : > { %p4948_p7 = pnand %p4946_p13, %p5235_p11  ;;  %p4954_p5 = scmp.lt.s32.totalorder %s4952_s21, %s4945_s6 }
  0xd8   : > { %p4949_p8 = pneg %p4948_p7  ;;  %p4955_p9 = por %p4954_p5, %p4953_p3 }
  0xda   : > { %p4956_p4 = pnand %p4955_p9, %p4949_p8 }
  0xdc   : > { %4959 = shalt.err (!%p4956_p4)
}
  0xdd   : > { %p5993_p6 = scmp.ne.s32.totalorder %s5975_s26, 0  ;;  %s5994_s8 = scalar_lea.sflag [#allocation13], %s5218_s2 }
  0xde   : > { %p5995_p10 = scmp.ne.s32.totalorder %s5981_s27, 0 }
  0xdf   : > { %4551 = dma.hbm_to_vmem [thread:$0]  (!%p5993_p6), %s5402_s0, 16, %s821_s12, %s5994_s8  }
  0xe0   : > { %829 = sbr.rel (%p5995_p10) target bundleno = 4867 (0x1303), region = 104  ;;  %s5427_s22 = sand.u32 (!%p5995_p10), 1, %s5028_s28  }
  0xe1   : > { %s832_s3 = scalar_lea.sflag (!%p5995_p10), [#allocation4], %s5427_s22  ;;  %p5996_p11 = scmp.ne.s32.totalorder (!%p5995_p10), %s5974_s24, 0 }
  0xe7   : > { %5003 = dma.done.wait (%p5996_p11), %s832_s3, 16  }
  0xe8   : > { %5005 = vsyncadd (%p5996_p11), %s832_s3, 4294967280  ;;  %s839_s26 = sand.u32 1, %s5186_s4  }
  0xe9   : > { %s840_s2 = scalar_lea.sflag [#allocation7], %s839_s26 }
  0xea   : > { %5007 = dma.done.wait (%p5996_p11), %s840_s2, 32  }
  0xeb   : > { %5009 = vsyncadd (%p5996_p11), %s840_s2, 4294967264  ;;  %s856_s12 = scalar_lea.sflag [#allocation10], %s839_s26 }
  0xec   : > { %5011 = dma.done.wait (%p5996_p11), %s856_s12, 32  }
  0xed   : > { %5013 = vsyncadd (%p5996_p11), %s856_s12, 4294967264  ;;  %s872_s5 = scalar_lea.sflag [#allocation13], %s839_s26 }
  0xee   : > { %5015 = dma.done.wait (%p5996_p11), %s872_s5, 32  }
  0xef   : > { %5017 = vsyncadd (%p5996_p11), %s872_s5, 4294967264  ;;  %p1000_p9 = scmp.lt.s32.totalorder %s5186_s4, 1  ;;  %s5998_s24 = sld [smem:[#allocation27_spill]] }
  0xf0   : > { %s5999_s30 = sld [smem:[#allocation28_spill]]  ;;  %s6000_s27 = sld [smem:[#allocation29_spill]] }
  0xf1   : > { %s5455_s20 = scalar_select %p1000_p9, %s5186_s4, 1 }
  0xf2   : > { %p3995_p1 = scmp.ne.s32.totalorder %s5186_s4, 0 }
  0xf3   : > { %s4095_s6 = sshll.u32 %s5455_s20, 4  ;;  %s6001_s3 = sld [smem:[#allocation25_spill]] (!%p3995_p1)  ;;  %vm1049_vm0 = vcmask (!%p3995_p1), 64512   ;;  %vm1153_vm1 = vcmask (!%p3995_p1), 261120  }
  0xf4   : > { %s5480_s25 = scalar_lea.vmem %s5931_s9, %s4095_s6  ;;  %s5489_s12 = scalar_lea.vmem %s5935_s13, %s4095_s6 }
  0xf5   : > { %s5465_s2 = scalar_lea.vmem %s5998_s24, %s4095_s6  ;;  %1043 = sbr.rel (%p3995_p1) target bundleno = 472 (0x1d8), region = 136 }
  0xf6   : > { %s5470_s1 = scalar_lea.vmem %s5999_s30, %s4095_s6  ;;  %s5475_s29 = scalar_lea.vmem %s6000_s27, %s4095_s6 }
  0xf7   : > { %s4100_s30 = sshll.u32 %s5455_s20, 5  ;;  %s1038_s27 = scalar_lea.vmem %s5939_s17, %s5455_s20 }
  0xf8   : > { %s5499_s7 = scalar_lea.vmem %s5937_s15, %s4100_s30  ;;  %s6002_s24 = sld [smem:[#allocation24_spill]] (!%p3995_p1) }
  0xf9   : > { %v1048_v0 = vld [vmem:[%s6001_s3] sm:$0xff] (!%p3995_p1)  ;;  %s6003_s21 = sld [smem:[#allocation26_spill]] (!%p3995_p1) }
  0xfa   : > { %4209 = vmatprep.subr.mxu0 (!%p3995_p1), %v1048_v0  ;;  %4494 = vmatprep.subr.mxu1 (!%p3995_p1), %v1048_v0 }
  0xfb   : > { %4210 = vmatpush3.msra.mxu0 (!%p3995_p1), %v1048_v0  ;;  %4495 = vmatpush3.msra.mxu1 (!%p3995_p1), %v1048_v0 }
  0xfe   : > { %v1044_v1 = vld [vmem:[%s6002_s24] sm:$0xff]  ;;  %v1046_v2 = vld [vmem:[%s6002_s24 + $0x10] sm:$0xff]  ;;  %v1045_v3 = vld [vmem:[%s6002_s24 + $0x8] sm:$0xff] }
  0xff   : > { %v1047_v4 = vld [vmem:[%s6002_s24 + $0x18] sm:$0xff]  ;;  %4211 = vmatprep.mubr.msk.f32.mxu0 %vm1049_vm0, %v1044_v1  ;;  %4214 = vmatprep.mubr.msk.f32.mxu1 %vm1049_vm0, %v1046_v2  ;;  %v1148_v5 = vld [vmem:[%s6003_s21 + $0x8] sm:$0xff]  ;;  %v1147_v6 = vld [vmem:[%s6003_s21] sm:$0xff] }
 0x100   : > { %4212 = vmatmul.mubr.msk.f32.vlgmr.msra.gmra.mrb[0].mxu0 %vm1049_vm0, %v1045_v3  ;;  %4215 = vmatmul.mubr.msk.f32.vlgmr.msra.gmra.mrb[0].mxu1 %vm1049_vm0, %v1047_v4 }
 0x1d3   : > { %v4213_v7 = vpop.f32.mrb[0].mxu0  ;;  %v4216_v8 = vpop.f32.mrb[0].mxu1 }
 0x1d4   : > { %v1150_v9 = vadd.f32 %v4213_v7, %v1148_v5  ;;  %v1152_v10 = vadd.f32 %v4216_v8, %v1148_v5  ;;  %v1128_v11 = vpop.f32.mrb[1].mxu0  ;;  %v1138_v12 = vpop.f32.mrb[1].mxu1 }
 0x1d5   : > { %v1149_v13 = vadd.f32 %v1147_v6, %v1128_v11  ;;  %v1151_v14 = vadd.f32 %v1147_v6, %v1138_v12 }
 0x1d6   : > { %1155 = vst.msk [vmem:[#allocation2 + $0x8] sm:$0xff] %vm1153_vm1, %v1150_v9  ;;  %1157 = vst.msk [vmem:[#allocation2 + $0x18] sm:$0xff] %vm1153_vm1, %v1152_v10 }
 0x1d7   : > { %1154 = vst.msk [vmem:[#allocation2] sm:$0xff] %vm1153_vm1, %v1149_v13  ;;  %1156 = vst.msk [vmem:[#allocation2 + $0x10] sm:$0xff] %vm1153_vm1, %v1151_v14 }
 0x1d8 PF: > { %v4654_v15 = vld [vmem:[%s5465_s2] sm:$0xff]   ;;  %v4655_v16 = vld [vmem:[%s5465_s2 + $0x8] sm:$0xff]   ;;  %vm1199_vm2 = vcmask 261120   ;;  %s6004_s10 = sld [smem:[#allocation30_spill]]  ;;  %vm1398_vm3 = vcmask 64512   ;;  %s6009_s5 = scalar_lea.vmem [#allocation6], %s5427_s22  ;;  %v1395_v3 = vlaneseq }
 0x1d9   : > { %4217 = vmatprep.subr.bf16.mxu1 %v4654_v15  ;;  %v4656_v22 = vld [vmem:[%s5470_s1] sm:$0xff]   ;;  %v4657_v24 = vld [vmem:[%s5470_s1 + $0x8] sm:$0xff]   ;;  %vm5553_vm4 = vmpackc.low %vm1398_vm3, %vm1398_vm3  ;;  %vm1579_vm6 = vcmask 130048   ;;  %s5045_s30 = smov 120   ;;  %s5046_s0 = smov 112   ;;  %vm2204_vm7 = vcmask 1043456  }
 0x1da   : > { %4218 = vmatpush3.bf16.msra.mxu1 %v4654_v15  ;;  %v4658_v25 = vld [vmem:[%s5475_s29] sm:$0xff]   ;;  %v4659_v26 = vld [vmem:[%s5475_s29 + $0x8] sm:$0xff]   ;;  %s6006_s29 = scalar_lea.vmem [#allocation3], %s5427_s22  ;;  %v5586_v4 = vand.u32 127, %v1395_v3  ;;  %s5047_s19 = smov 104   ;;  %vm3466_vm8 = vcmask 523264  }
 0x1db   : > { %4219 = vmatprep.subr.bf16.mxu1 %v4655_v16  ;;  %4233 = vmatprep.subr.bf16.mxu0 %v4658_v25  ;;  %v4005_v37 = vld [vmem:[%s6006_s29] ss:$0 sm:$0xff]  ;;  %s6010_s3 = scalar_lea.vmem [#allocation8], %s5427_s22  ;;  %s6011_s23 = scalar_lea.vmem %s5933_s11, %s5455_s20 }
 0x1dc   : > { %4234 = vmatpush3.bf16.msra.mxu0 %v4658_v25  ;;  %v4010_v58 = vld [vmem:[%s6009_s5] ss:$0 sm:$0xff]  ;;  %vm1397_vm5 = vcmp.lt.s32.totalorder %v5586_v4, 9  ;;  %s6012_s6 = scalar_lea.vmem [#allocation9], %s5427_s22  ;;  %s6013_s26 = scalar_lea.vmem [#allocation11], %s5427_s22 }
 0x1dd   : > { %v1159_v18 = vld [vmem:[#allocation2 + $0x8] sm:$0xff]  ;;  %v1161_v21 = vld [vmem:[#allocation2 + $0x18] sm:$0xff]  ;;  %4235 = vmatprep.subr.bf16.mxu0 %v4659_v26  ;;  %p4088_p12 = scmp.ne.s32.totalorder %s5186_s4, 1 }
 0x1de   : > { %v1158_v17 = vld [vmem:[#allocation2] sm:$0xff]  ;;  %v1160_v19 = vld [vmem:[#allocation2 + $0x10] sm:$0xff]  ;;  %4220 = vmatpush3.bf16.msra.mxu1 %v4655_v16  ;;  %s6005_s8 = scalar_lea.vmem %s6004_s10, %s5455_s20  ;;  %s6015_s10 = scalar_lea.vmem [#allocation14], %s5427_s22  ;;  %vm5049_vm9 = vmmov (!%p4088_p12), 0   ;;  %vm3626_vm10 = vcmask (!%p4088_p12), 1041409   ;;  %vm3700_vm11 = vcmask (!%p4088_p12), 254976  }
 0x1df   : > { %v1162_v20 = vpack.c.bf16 %v1159_v18, %v1158_v17  ;;  %v1163_v23 = vpack.c.bf16 %v1161_v21, %v1160_v19  ;;  %4225 = vmatprep.subr.bf16.mxu1 %v4656_v22  ;;  %v4000_v27 = vld [vmem:[%s6005_s8] ss:$0 sm:$0xff]  ;;  %s6018_s20 = sld [smem:[#allocation36_spill]] (!%p4088_p12) }
 0x1e0   : > { %4236 = vmatpush3.bf16.msra.mxu0 %v4659_v26 }
 0x1e1   : > { %4221 = vmatprep.mubr.msk.bf16.mxu1 %vm1199_vm2, %v1162_v20  ;;  %4237 = vmatprep.mubr.msk.bf16.mxu0 %vm1199_vm2, %v1162_v20 }
 0x1e2   : > { %4222 = vmatmul.mubr.msk.bf16.vlgmr.msra.gmra.mrb[0].mxu1 %vm1199_vm2, %v1163_v23 }
 0x1e3   : > { %4226 = vmatpush3.bf16.msra.mxu1 %v4656_v22  ;;  %4229 = vmatprep.mubr.msk.bf16.mxu1 %vm1199_vm2, %v1162_v20 }
 0x1e4   : > { %4227 = vmatprep.subr.bf16.mxu1 %v4657_v24  ;;  %4238 = vmatmul.mubr.msk.bf16.vlgmr.msra.gmra.mrb[0].mxu0 %vm1199_vm2, %v1163_v23 }
 0x1e7   : > { %4228 = vmatpush3.bf16.msra.mxu1 %v4657_v24 }
 0x1ea   : > { %4230 = vmatmul.mubr.msk.bf16.vlgmr.msra.gmra.mrb[4].mxu1 %vm1199_vm2, %v1163_v23 }
 0x2b5   : > { %v4223_v28 = vpop.f32.mrb[0].mxu1 }
 0x2b6   : > { %v1249_v29 = vadd.f32 %v4223_v28, %v4000_v27  ;;  %v1240_v30 = vpop.f32.mrb[1].mxu1 }
 0x2b7   : > { %v1241_v31 = vadd.f32 %v4000_v27, %v1240_v30  ;;  %v4224_v32 = vpop.f32.mrb[2].mxu1  ;;  %v4239_v54 = vpop.f32.mrb[0].mxu0 }
 0x2b8   : > { %v5541_v33 = vmul.f32 0.35355338, %v1249_v29  ;;  %v1243_v34 = vpop.f32.mrb[3].mxu1  ;;  %v1252_v50 = vadd.f32 %v4224_v32, %v4000_v27  ;;  %v1380_v55 = vpop.f32.mrb[1].mxu0  ;;  %v1389_v61 = vadd.f32 %v4239_v54, %v4010_v58 }
 0x2b9   : > { %v5543_v35 = vmul.f32 0.35355338, %v1241_v31  ;;  %v1244_v51 = vadd.f32 %v4000_v27, %v1243_v34  ;;  %v4240_v56 = vpop.f32.mrb[2].mxu0  ;;  %v1381_v59 = vadd.f32 %v4010_v58, %v1380_v55 }
 0x2ba   : > { %4252 = vmatprep.mubr.msk.f32.mxu0 %vm1398_vm3, %v5541_v33  ;;  %v5569_v52 = vmul.f32 0.35355338, %v1252_v50  ;;  %v1383_v57 = vpop.f32.mrb[3].mxu0  ;;  %v1392_v62 = vadd.f32 %v4240_v56, %v4010_v58 }
 0x2bb   : > { %4245 = vmatprep.mubr.msk.f32.mxu1 %vm1398_vm3, %v5543_v35  ;;  %v5571_v53 = vmul.f32 0.35355338, %v1244_v51  ;;  %v1384_v60 = vadd.f32 %v4010_v58, %v1383_v57 }
 0x2bc   : > { %v5579_v0 = vpack.c.bf16 %v1392_v62, %v1389_v61  ;;  %v5583_v2 = vpack.i.bf16 %v1392_v62, %v1389_v61 }
 0x2bd   : > { %v4231_v36 = vpop.f32.mrb[4].mxu1  ;;  %v4420_v63 = vpack.c.bf16 %v1384_v60, %v1381_v59  ;;  %v5581_v1 = vpack.i.bf16 %v1384_v60, %v1381_v59 }
 0x2be   : > { %v1312_v38 = vpop.f32.mrb[5].mxu1  ;;  %v1321_v40 = vadd.f32 %v4231_v36, %v4005_v37 }
 0x2bf   : > { %v4232_v39 = vpop.f32.mrb[6].mxu1  ;;  %v1313_v43 = vadd.f32 %v4005_v37, %v1312_v38 }
 0x2c0   : > { %v1324_v41 = vadd.f32 %v4232_v39, %v4005_v37  ;;  %v1315_v42 = vpop.f32.mrb[7].mxu1 }
 0x2c1   : > { %v1316_v44 = vadd.f32 %v4005_v37, %v1315_v42 }
 0x2c2   : > { %v4414_v46 = vpack.c.bf16 %v1324_v41, %v1321_v40  ;;  %v5557_v47 = vpack.i.bf16 %v1324_v41, %v1321_v40 }
 0x2c3   : > { %v4408_v48 = vpack.c.bf16 %v1316_v44, %v1313_v43  ;;  %v5559_v49 = vpack.i.bf16 %v1316_v44, %v1313_v43 }
 0x2c4   : > { %4416 = vmatprep.subr.msk.bf16.mxu0 %vm5553_vm4, %v4414_v46 }
 0x2c5   : > { %4410 = vmatprep.subr.msk.bf16.mxu1 %vm5553_vm4, %v4408_v48  ;;  %4419 = vmatpush3.bf16.xpose.msk.msra.mxu0 %vm5553_vm4, %v4414_v46 }
 0x2c6   : > { %4413 = vmatpush3.bf16.xpose.msk.msra.mxu1 %vm5553_vm4, %v4408_v48 }
 0x2c7   : > { %4421 = vmatprep.subr.bf16.mxu1 %v4420_v63 }
 0x2cc   : > { %4253 = vmatmul.mubr.msk.f32.vlgmr.msra.gmra.mrb[4].mxu0 %vm1398_vm3, %v5569_v52 }
 0x2cd   : > { %4246 = vmatmul.mubr.msk.f32.vlgmr.msra.gmra.mrb[8].mxu1 %vm1398_vm3, %v5571_v53 }
 0x2ce   : > { %4423 = vmatpush3.bf16.msra.mxu1 %v4420_v63 }
 0x2cf   : > { %4425 = vmatprep.subr.bf16.mxu1 %v5579_v0 }
 0x39f   : > { %v4254_v5 = vpop.f32.mrb[4].mxu0 }
 0x3a0   : > { %v4247_v6 = vpop.f32.mrb[8].mxu1  ;;  %v1564_v7 = vpop.f32.mrb[5].mxu0  ;;  %v1578_v12 = vsel %vm1397_vm5, %v4254_v5, -1e+30 }
 0x3a1   : > { %v1577_v8 = vsel %vm1397_vm5, %v1564_v7, -1e+30  ;;  %v1477_v9 = vpop.f32.mrb[9].mxu1  ;;  %v1576_v14 = vsel %vm1397_vm5, %v4247_v6, -1e+30  ;;  %v1589_v15 = vsel %vm1579_vm6, %v1578_v12, -inf }
 0x3a2   : > { %v1575_v10 = vsel %vm1397_vm5, %v1477_v9, -1e+30  ;;  %v1586_v11 = vsel %vm1579_vm6, %v1577_v8, -inf  ;;  %v1583_v16 = vsel %vm1579_vm6, %v1576_v14, -inf }
 0x3a3   : > { %1587 = vmax.xlane.f32.xlu1 %v1586_v11  ;;  %v1580_v13 = vsel %vm1579_vm6, %v1575_v10, -inf }
 0x3a4   : > { %1581 = vmax.xlane.f32.xlu0 %v1580_v13 }
 0x3a7   : > { %1590 = vmax.xlane.f32.xlu1 %v1589_v15 }
 0x3a8   : > { %1584 = vmax.xlane.f32.xlu0 %v1583_v16 }
 0x430   : > { %v1588_v17 = vpop.xlane.xlu1 %1587 }
 0x431   : > { %v1594_v18 = vsub.f32 %v1577_v8, %v1588_v17  ;;  %v1582_v19 = vpop.xlane.xlu0 %1581 }
 0x432   : > { %v1592_v20 = vsub.f32 %v1575_v10, %v1582_v19 }
 0x433   : > { %v1600_v21 = vmul.f32 1.442695, %v1594_v18 }
 0x434   : > { %v1596_v22 = vmul.f32 1.442695, %v1592_v20  ;;  %v1591_v23 = vpop.xlane.xlu1 %1590 }
 0x435   : > { %v1595_v24 = vsub.f32 %v1578_v12, %v1591_v23  ;;  %v1585_v25 = vpop.xlane.xlu0 %1584 }
 0x436   : > { %4666 = vpow2.f32 %v1596_v22  ;;  %v1593_v26 = vsub.f32 %v1576_v14, %v1585_v25 }
 0x437   : > { %4668 = vpow2.f32 %v1600_v21  ;;  %v1602_v27 = vmul.f32 1.442695, %v1595_v24 }
 0x438   : > { %v1598_v28 = vmul.f32 1.442695, %v1593_v26 }
 0x43a   : > { %4670 = vpow2.f32 %v1598_v28 }
 0x43b   : > { %4672 = vpow2.f32 %v1602_v27 }
 0x440   : > { %v4667_v29 = vpop.eup %4666 }
 0x441   : > { %v1604_v30 = vsel %vm1579_vm6, %v4667_v29, 0.0  ;;  %v4669_v31 = vpop.eup %4668 }
 0x442   : > { %1605 = vadd.xlane.f32.xlu0 %v1604_v30  ;;  %v1610_v34 = vsel %vm1579_vm6, %v4669_v31, 0.0 }
 0x444   : > { %v4671_v32 = vpop.eup %4670 }
 0x445   : > { %v1607_v36 = vsel %vm1579_vm6, %v4671_v32, 0.0  ;;  %v4673_v37 = vpop.eup %4672 }
 0x446   : > { %1611 = vadd.xlane.f32.xlu0 %v1610_v34  ;;  %1608 = vadd.xlane.f32.xlu1 %v1607_v36  ;;  %v1613_v38 = vsel %vm1579_vm6, %v4673_v37, 0.0 }
 0x44a   : > { %1614 = vadd.xlane.f32.xlu1 %v1613_v38 }
 0x45b   : > { %1879 = vrot.lane.b32.xlu1 %v5541_v33, %s5045_s30 }
 0x45c   : > { %4595 = vrot.lane.b32.xlu0 %v5557_v47, %s5045_s30 }
 0x45f   : > { %1881 = vrot.lane.b32.xlu1 %v5569_v52, %s5045_s30 }
 0x460   : > { %1788 = vrot.lane.b32.xlu0 %v5543_v35, %s5045_s30 }
 0x463   : > { %4600 = vrot.lane.b32.xlu1 %v5559_v49, %s5045_s30 }
 0x467   : > { %1790 = vrot.lane.b32.xlu1 %v5571_v53, %s5045_s30 }
 0x4cf   : > { %v1606_v39 = vpop.xlane.xlu0 %1605 }
 0x4d0   : > { %4674 = vrcp.f32 %v1606_v39 }
 0x4d3   : > { %v1609_v40 = vpop.xlane.xlu1 %1608  ;;  %v1612_v41 = vpop.xlane.xlu0 %1611 }
 0x4d4   : > { %4676 = vrcp.f32 %v1609_v40 }
 0x4d5   : > { %4678 = vrcp.f32 %v1612_v41 }
 0x4d7   : > { %v1615_v42 = vpop.xlane.xlu1 %1614  ;;  %v4596_v43 = vpop.permute.xlu0 %4595 }
 0x4d8   : > { %4680 = vrcp.f32 %v1615_v42  ;;  %v4598_v51 = vunpack.i.h.bf16 %v4596_v43  ;;  %v4597_v54 = vunpack.i.l.bf16 %v4596_v43 }
 0x4da   : > { %v4675_v44 = vpop.eup %4674  ;;  %v4434_v60 = vpack.c.bf16 %v4598_v51, %v4597_v54 }
 0x4db   : > { %v1880_v46 = vpop.permute.xlu1 %1879  ;;  %v1789_v48 = vpop.permute.xlu0 %1788  ;;  %v1620_v50 = vmul.f32 %v4675_v44, %v4667_v29 }
 0x4dc   : > { %4273 = vmatprep.mubr.msk.f32.mxu0 %vm1398_vm3, %v1789_v48 }
 0x4dd   : > { %4259 = vmatprep.mubr.msk.f32.mxu1 %vm1579_vm6, %v1620_v50 }
 0x4de   : > { %v4677_v55 = vpop.eup %4676 }
 0x4df   : > { %v4679_v56 = vpop.eup %4678  ;;  %v1621_v57 = vmul.f32 %v4677_v55, %v4671_v32  ;;  %v1882_v58 = vpop.permute.xlu1 %1881 }
 0x4e0   : > { %v1622_v59 = vmul.f32 %v4679_v56, %v4669_v31 }
 0x4e1   : > { %4260 = vmatmul.mubr.msk.f32.vlgmr.msra.gmra.mrb[10].mxu1 %vm1579_vm6, %v1621_v57 }
 0x4e2   : > { %v4681_v61 = vpop.eup %4680  ;;  %4427 = vmatpush3.bf16.msra.mxu1 %v5579_v0  ;;  %4266 = vmatprep.mubr.msk.f32.mxu1 %vm1579_vm6, %v1622_v59 }
 0x4e3   : > { %v1623_v62 = vmul.f32 %v4681_v61, %v4673_v37  ;;  %4436 = vmatprep.subr.msk.bf16.mxu1 %vm5553_vm4, %v4434_v60  ;;  %v4601_v63 = vpop.permute.xlu1 %4600 }
 0x4e4   : > { %v4603_v3 = vunpack.i.h.bf16 %v4601_v63  ;;  %v4602_v5 = vunpack.i.l.bf16 %v4601_v63 }
 0x4e5   : > { %4267 = vmatmul.mubr.msk.f32.vlgmr.msra.gmra.mrb[12].mxu1 %vm1579_vm6, %v1623_v62 }
 0x4e6   : > { %v4428_v6 = vpack.c.bf16 %v4603_v3, %v4602_v5  ;;  %4280 = vmatprep.mubr.msk.f32.mxu1 %vm1398_vm3, %v1880_v46 }
 0x4e7   : > { %v1791_v0 = vpop.permute.xlu1 %1790 }
 0x4e8   : > { %4430 = vmatprep.subr.msk.bf16.mxu0 %vm5553_vm4, %v4428_v6 }
 0x4e9   : > { %4433 = vmatpush3.bf16.xpose.msk.msra.mxu0 %vm5553_vm4, %v4428_v6 }
 0x4eb   : > { %4439 = vmatpush3.bf16.xpose.msk.msra.mxu1 %vm5553_vm4, %v4434_v60 }
 0x4f0   : > { %4274 = vmatmul.mubr.msk.f32.vlgmr.msra.gmra.mrb[6].mxu0 %vm1398_vm3, %v1791_v0 }
 0x4f2   : > { %4281 = vmatmul.mubr.msk.f32.vlgmr.msra.gmra.mrb[14].mxu1 %vm1398_vm3, %v1882_v58 }
 0x5b4   : > { %v5634_v7 = vpop.f32.mrb[10].mxu1 }
 0x5b5   : > { %v5636_v8 = vpop.f32.mrb[11].mxu1 }
 0x5b6   : > { %v1786_v9 = vpack.c.bf16 %v5634_v7, %v5636_v8 }
 0x5b8   : > { %v5640_v10 = vpop.f32.mrb[12].mxu1 }
 0x5b9   : > { %v5642_v11 = vpop.f32.mrb[13].mxu1 }
 0x5ba   : > { %v1787_v12 = vpack.c.bf16 %v5640_v10, %v5642_v11 }
 0x5c3   : > { %v4275_v13 = vpop.f32.mrb[6].mxu0 }
 0x5c4   : > { %v1870_v14 = vpop.f32.mrb[7].mxu0  ;;  %v1971_v48 = vsel %vm1397_vm5, %v4275_v13, -1e+30 }
 0x5c5   : > { %v4282_v15 = vpop.f32.mrb[14].mxu1  ;;  %v1970_v21 = vsel %vm1397_vm5, %v1870_v14, -1e+30  ;;  %v1977_v50 = vsel %vm1579_vm6, %v1971_v48, -inf }
 0x5c6   : > { %v1973_v16 = vsel %vm1397_vm5, %v4282_v15, -1e+30  ;;  %v1961_v17 = vpop.f32.mrb[15].mxu1  ;;  %v1974_v22 = vsel %vm1579_vm6, %v1970_v21, -inf }
 0x5c7   : > { %v1972_v18 = vsel %vm1397_vm5, %v1961_v17, -1e+30  ;;  %v1983_v19 = vsel %vm1579_vm6, %v1973_v16, -inf }
 0x5c8   : > { %1984 = vmax.xlane.f32.xlu1 %v1983_v19  ;;  %v1980_v20 = vsel %vm1579_vm6, %v1972_v18, -inf }
 0x5c9   : > { %1981 = vmax.xlane.f32.xlu0 %v1980_v20 }
 0x5d9   : > { %4610 = vrot.lane.b32.xlu1 %v5559_v49, %s5046_s0 }
 0x5dd   : > { %4615 = vrot.lane.b32.xlu1 %v5557_v47, %s5046_s0 }
 0x5e1   : > { %2315 = vrot.lane.b32.xlu1 %v5543_v35, %s5046_s0 }
 0x5e5   : > { %2406 = vrot.lane.b32.xlu1 %v5541_v33, %s5046_s0 }
 0x609   : > { %1975 = vmax.xlane.f32.xlu1 %v1974_v22 }
 0x61a   : > { %4620 = vrot.lane.b32.xlu1 %v5581_v1, %s5045_s30 }
 0x655   : > { %v1985_v23 = vpop.xlane.xlu1 %1984 }
 0x656   : > { %v1989_v24 = vsub.f32 %v1973_v16, %v1985_v23  ;;  %v1982_v25 = vpop.xlane.xlu0 %1981 }
 0x657   : > { %v1988_v26 = vsub.f32 %v1972_v18, %v1982_v25 }
 0x658   : > { %v1996_v27 = vmul.f32 1.442695, %v1989_v24 }
 0x659   : > { %v1994_v28 = vmul.f32 1.442695, %v1988_v26  ;;  %v4611_v34 = vpop.permute.xlu1 %4610 }
 0x65a   : > { %4682 = vpow2.f32 %v1996_v27  ;;  %v4613_v58 = vunpack.i.h.bf16 %v4611_v34  ;;  %v4612_v59 = vunpack.i.l.bf16 %v4611_v34 }
 0x65b   : > { %4684 = vpow2.f32 %v1994_v28 }
 0x65c   : > { %v4448_v63 = vpack.c.bf16 %v4613_v58, %v4612_v59 }
 0x65d   : > { %v4616_v36 = vpop.permute.xlu1 %4615 }
 0x65e   : > { %v4618_v13 = vunpack.i.h.bf16 %v4616_v36  ;;  %v4617_v14 = vunpack.i.l.bf16 %v4616_v36 }
 0x660   : > { %v4454_v15 = vpack.c.bf16 %v4618_v13, %v4617_v14 }
 0x661   : > { %v2316_v37 = vpop.permute.xlu1 %2315 }
 0x664   : > { %v4683_v29 = vpop.eup %4682 }
 0x665   : > { %v2007_v30 = vsel %vm1579_vm6, %v4683_v29, 0.0  ;;  %v4685_v31 = vpop.eup %4684  ;;  %v2407_v38 = vpop.permute.xlu1 %2406 }
 0x666   : > { %2008 = vadd.xlane.f32.xlu0 %v2007_v30  ;;  %v2004_v32 = vsel %vm1579_vm6, %v4685_v31, 0.0 }
 0x66a   : > { %2005 = vadd.xlane.f32.xlu0 %v2004_v32 }
 0x680   : > { %4605 = vrot.lane.b32.xlu0 %v5583_v2, %s5045_s30 }
 0x684   : > { %2317 = vrot.lane.b32.xlu0 %v5571_v53, %s5046_s0 }
 0x688   : > { %2408 = vrot.lane.b32.xlu0 %v5569_v52, %s5046_s0 }
 0x696   : > { %v1976_v39 = vpop.xlane.xlu1 %1975 }
 0x697   : > { %v1986_v40 = vsub.f32 %v1970_v21, %v1976_v39 }
 0x699   : > { %v1990_v41 = vmul.f32 1.442695, %v1986_v40 }
 0x69a   : > { %v4621_v42 = vpop.permute.xlu1 %4620 }
 0x69b   : > { %v4623_v43 = vunpack.i.h.bf16 %v4621_v42  ;;  %v4622_v44 = vunpack.i.l.bf16 %v4621_v42  ;;  %4686 = vpow2.f32 %v1990_v41 }
 0x69d   : > { %v4440_v46 = vpack.c.bf16 %v4623_v43, %v4622_v44 }
 0x69f   : > { %4441 = vmatprep.subr.bf16.mxu0 %v4440_v46 }
 0x6a0   : > { %4443 = vmatpush3.bf16.msra.mxu0 %v4440_v46 }
 0x6a5   : > { %v4687_v51 = vpop.eup %4686 }
 0x6a6   : > { %v1998_v54 = vsel %vm1579_vm6, %v4687_v51, 0.0 }
 0x6a7   : > { %1978 = vmax.xlane.f32.xlu0 %v1977_v50 }
 0x6ab   : > { %1999 = vadd.xlane.f32.xlu0 %v1998_v54 }
 0x6f3   : > { %v2009_v55 = vpop.xlane.xlu0 %2008 }
 0x6f4   : > { %4688 = vrcp.f32 %v2009_v55 }
 0x6f7   : > { %v2006_v56 = vpop.xlane.xlu0 %2005 }
 0x6f8   : > { %4690 = vrcp.f32 %v2006_v56 }
 0x6fb   : > { %v4606_v57 = vpop.permute.xlu0 %4605 }
 0x6fc   : > { %v4608_v60 = vunpack.i.h.bf16 %v4606_v57  ;;  %v4607_v61 = vunpack.i.l.bf16 %v4606_v57 }
 0x6fe   : > { %v4444_v62 = vpack.c.bf16 %v4608_v60, %v4607_v61  ;;  %v4689_v3 = vpop.eup %4688 }
 0x6ff   : > { %v2017_v0 = vmul.f32 %v4689_v3, %v4683_v29  ;;  %v2318_v16 = vpop.permute.xlu0 %2317 }
 0x700   : > { %4445 = vmatprep.subr.bf16.mxu1 %v4444_v62 }
 0x701   : > { %4447 = vmatpush3.bf16.msra.mxu1 %v4444_v62 }
 0x702   : > { %v4691_v5 = vpop.eup %4690  ;;  %4450 = vmatprep.subr.msk.bf16.mxu1 %vm5553_vm4, %v4448_v63 }
 0x703   : > { %v2016_v6 = vmul.f32 %v4691_v5, %v4685_v31  ;;  %v2409_v17 = vpop.permute.xlu0 %2408 }
 0x705   : > { %4294 = vmatprep.mubr.msk.f32.mxu1 %vm1579_vm6, %v2016_v6 }
 0x706   : > { %4295 = vmatmul.mubr.msk.f32.vlgmr.msra.gmra.mrb[16].mxu1 %vm1579_vm6, %v2017_v0 }
 0x707   : > { %4313 = vmatprep.mubr.msk.f32.mxu1 %vm1398_vm3, %v2316_v37 }
 0x70a   : > { %4453 = vmatpush3.bf16.xpose.msk.msra.mxu1 %vm5553_vm4, %v4448_v63 }
 0x70b   : > { %4456 = vmatprep.subr.msk.bf16.mxu1 %vm5553_vm4, %v4454_v15 }
 0x711   : > { %4314 = vmatmul.mubr.msk.f32.vlgmr.msra.gmra.mrb[18].mxu1 %vm1398_vm3, %v2318_v16 }
 0x712   : > { %4459 = vmatpush3.bf16.xpose.msk.msra.mxu1 %vm5553_vm4, %v4454_v15  ;;  %4320 = vmatprep.mubr.msk.f32.mxu1 %vm1398_vm3, %v2407_v38 }
 0x719   : > { %4321 = vmatmul.mubr.msk.f32.vlgmr.msra.gmra.mrb[20].mxu1 %vm1398_vm3, %v2409_v17 }
 0x734   : > { %v1979_v18 = vpop.xlane.xlu0 %1978 }
 0x735   : > { %v1987_v19 = vsub.f32 %v1971_v48, %v1979_v18  ;;  %v1177_v48 = vld [vmem:[%s5480_s25 + $0x4] sm:$0xf] }
 0x736   : > { %4508 = vmatprep.subr.msk.bf16.mxu0 %vm2204_vm7, %v1177_v48  ;;  %v2206_v50 = vsel %vm2204_vm7, %v1177_v48, 0 }
 0x737   : > { %v1992_v20 = vmul.f32 1.442695, %v1987_v19 }
 0x738   : > { %v2000_v21 = vpop.xlane.xlu0 %1999 }
 0x739   : > { %4692 = vpow2.f32 %v1992_v20 }
 0x73a   : > { %4694 = vrcp.f32 %v2000_v21 }
 0x743   : > { %v4693_v22 = vpop.eup %4692 }
 0x744   : > { %v4695_v23 = vpop.eup %4694  ;;  %v2001_v24 = vsel %vm1579_vm6, %v4693_v22, 0.0 }
 0x745   : > { %2002 = vadd.xlane.f32.xlu0 %v2001_v24  ;;  %v2014_v25 = vmul.f32 %v4695_v23, %v4687_v51  ;;  %v1176_v51 = vld [vmem:[%s5480_s25] sm:$0xf] }
 0x747   : > { %4287 = vmatprep.mubr.msk.f32.mxu0 %vm1579_vm6, %v2014_v25 }
 0x7d2   : > { %v2003_v26 = vpop.xlane.xlu0 %2002 }
 0x7d3   : > { %4696 = vrcp.f32 %v2003_v26 }
 0x7d9   : > { %v5693_v27 = vpop.f32.mrb[16].mxu1 }
 0x7da   : > { %v5695_v28 = vpop.f32.mrb[17].mxu1 }
 0x7db   : > { %v2197_v29 = vpack.c.bf16 %v5693_v27, %v5695_v28  ;;  %v1178_v27 = vld [vmem:[%s5480_s25 + $0x8] sm:$0xf] }
 0x7dd   : > { %v4697_v30 = vpop.eup %4696 }
 0x7de   : > { %v2015_v31 = vmul.f32 %v4697_v30, %v4693_v22  ;;  %v2264_v22 = vsel %vm2204_vm7, %v1176_v51, 0 }
 0x7e0   : > { %4288 = vmatmul.mubr.msk.f32.vlgmr.msra.gmra.mrb[8].mxu0 %vm1579_vm6, %v2015_v31 }
 0x7e1   : > { %4298 = vmatpush3.bf16.msra.mxu0 %v2206_v50 }
 0x7e2   : > { %4509 = vmatprep.subr.msk.bf16.mxu0 %vm2204_vm7, %v1176_v51 }
 0x7e4   : > { %v4315_v32 = vpop.f32.mrb[18].mxu1 }
 0x7e5   : > { %v2498_v34 = vsel %vm1397_vm5, %v4315_v32, -1e+30  ;;  %v2397_v36 = vpop.f32.mrb[19].mxu1 }
 0x7e6   : > { %v2504_v37 = vsel %vm1579_vm6, %v2498_v34, -inf  ;;  %v2497_v38 = vsel %vm1397_vm5, %v2397_v36, -1e+30  ;;  %v2728_v36 = vsel %vm2204_vm7, %v1178_v27, 0 }
 0x7e7   : > { %2505 = vmax.xlane.f32.xlu0 %v2504_v37  ;;  %v2501_v39 = vsel %vm1579_vm6, %v2497_v38, -inf }
 0x7eb   : > { %2502 = vmax.xlane.f32.xlu0 %v2501_v39 }
 0x7ec   : > { %v4322_v40 = vpop.f32.mrb[20].mxu1 }
 0x7ed   : > { %v2488_v41 = vpop.f32.mrb[21].mxu1  ;;  %v2500_v44 = vsel %vm1397_vm5, %v4322_v40, -1e+30 }
 0x7ee   : > { %v2499_v42 = vsel %vm1397_vm5, %v2488_v41, -1e+30  ;;  %v2510_v46 = vsel %vm1579_vm6, %v2500_v44, -inf }
 0x7ef   : > { %v2507_v43 = vsel %vm1579_vm6, %v2499_v42, -inf }
 0x7f0   : > { %2508 = vmax.xlane.f32.xlu0 %v2507_v43 }
 0x7f4   : > { %2511 = vmax.xlane.f32.xlu0 %v2510_v46 }
 0x874   : > { %v2506_v54 = vpop.xlane.xlu0 %2505 }
 0x875   : > { %v2514_v55 = vsub.f32 %v2498_v34, %v2506_v54 }
 0x877   : > { %v2519_v56 = vmul.f32 1.442695, %v2514_v55 }
 0x878   : > { %v2503_v57 = vpop.xlane.xlu0 %2502 }
 0x879   : > { %4698 = vpow2.f32 %v2519_v56  ;;  %v2513_v58 = vsub.f32 %v2497_v38, %v2503_v57 }
 0x87b   : > { %v2517_v59 = vmul.f32 1.442695, %v2513_v58 }
 0x87d   : > { %4700 = vpow2.f32 %v2517_v59  ;;  %v2509_v60 = vpop.xlane.xlu0 %2508 }
 0x87e   : > { %v2515_v61 = vsub.f32 %v2499_v42, %v2509_v60 }
 0x880   : > { %v2521_v5 = vmul.f32 1.442695, %v2515_v61 }
 0x881   : > { %v2512_v62 = vpop.xlane.xlu0 %2511 }
 0x882   : > { %v2516_v63 = vsub.f32 %v2500_v44, %v2512_v62 }
 0x883   : > { %v5717_v3 = vpop.eup %4698 }
 0x884   : > { %v2523_v6 = vmul.f32 1.442695, %v2516_v63  ;;  %v2528_v0 = vsel %vm1579_vm6, %v5717_v3, 0.0 }
 0x885   : > { %2529 = vadd.xlane.f32.xlu0 %v2528_v0 }
 0x886   : > { %4702 = vpow2.f32 %v2523_v6 }
 0x887   : > { %v4701_v13 = vpop.eup %4700  ;;  %4704 = vpow2.f32 %v2521_v5 }
 0x888   : > { %v2525_v14 = vsel %vm1579_vm6, %v4701_v13, 0.0 }
 0x889   : > { %2526 = vadd.xlane.f32.xlu1 %v2525_v14 }
 0x890   : > { %v4703_v15 = vpop.eup %4702 }
 0x891   : > { %v2534_v16 = vsel %vm1579_vm6, %v4703_v15, 0.0  ;;  %v4705_v17 = vpop.eup %4704 }
 0x892   : > { %2535 = vadd.xlane.f32.xlu0 %v2534_v16  ;;  %v2531_v18 = vsel %vm1579_vm6, %v4705_v17, 0.0 }
 0x896   : > { %2532 = vadd.xlane.f32.xlu0 %v2531_v18 }
 0x89a   : > { %4630 = vrot.lane.b32.xlu1 %v5583_v2, %s5046_s0 }
 0x89e   : > { %2876 = vrot.lane.b32.xlu1 %v5569_v52, %s5047_s19 }
 0x8ac   : > { %4625 = vrot.lane.b32.xlu0 %v5581_v1, %s5046_s0 }
 0x8b0   : > { %4635 = vrot.lane.b32.xlu0 %v5559_v49, %s5047_s19 }
 0x8b3   : > { %v4289_v19 = vpop.f32.mrb[8].mxu0 }
 0x8b4   : > { %v2098_v20 = vpop.f32.mrb[9].mxu0  ;;  %4640 = vrot.lane.b32.xlu0 %v5557_v47, %s5047_s19 }
 0x8b5   : > { %v2196_v21 = vpack.c.bf16 %v4289_v19, %v2098_v20 }
 0x8b7   : > { %4299 = vmatprep.mubr.msk.bf16.mxu0 %vm1398_vm3, %v2196_v21 }
 0x8b8   : > { %2783 = vrot.lane.b32.xlu0 %v5543_v35, %s5047_s19  ;;  %4300 = vmatmul.mubr.msk.bf16.vlgmr.msra.gmra.mrb[12].mxu0 %vm1398_vm3, %v2197_v29 }
 0x8b9   : > { %4305 = vmatprep.mubr.msk.bf16.mxu0 %vm1398_vm3, %v1786_v9  ;;  %4304 = vmatpush3.bf16.msra.mxu0 %v2264_v22 }
 0x8bc   : > { %2785 = vrot.lane.b32.xlu0 %v5571_v53, %s5047_s19 }
 0x8c0   : > { %2874 = vrot.lane.b32.xlu0 %v5541_v33, %s5047_s19 }
 0x8c4   : > { %4306 = vmatmul.mubr.msk.bf16.vlgmr.msra.gmra.mrb[12].mxu0 %vm1398_vm3, %v1787_v12 }
 0x912   : > { %v2530_v49 = vpop.xlane.xlu0 %2529 }
 0x916   : > { %v2527_v35 = vpop.xlane.xlu1 %2526 }
 0x917   : > { %4706 = vrcp.f32 %v2527_v35 }
 0x918   : > { %4708 = vrcp.f32 %v2530_v49 }
 0x91a   : > { %v4631_v47 = vpop.permute.xlu1 %4630 }
 0x91b   : > { %v4633_v52 = vunpack.i.h.bf16 %v4631_v47  ;;  %v4632_v7 = vunpack.i.l.bf16 %v4631_v47 }
 0x91d   : > { %v4464_v8 = vpack.c.bf16 %v4633_v52, %v4632_v7 }
 0x91e   : > { %v2877_v62 = vpop.permute.xlu1 %2876 }
 0x91f   : > { %4465 = vmatprep.subr.bf16.mxu1 %v4464_v8  ;;  %v2536_v9 = vpop.xlane.xlu0 %2535 }
 0x920   : > { %4467 = vmatpush3.bf16.msra.mxu1 %v4464_v8  ;;  %4710 = vrcp.f32 %v2536_v9 }
 0x921   : > { %v4707_v53 = vpop.eup %4706 }
 0x922   : > { %v2541_v23 = vmul.f32 %v4707_v53, %v4701_v13  ;;  %v4709_v25 = vpop.eup %4708 }
 0x923   : > { %v2533_v33 = vpop.xlane.xlu0 %2532  ;;  %v2542_v32 = vmul.f32 %v4709_v25, %v5717_v3 }
 0x924   : > { %4712 = vrcp.f32 %v2533_v33  ;;  %4327 = vmatprep.mubr.msk.f32.mxu0 %vm1579_vm6, %v2541_v23 }
 0x927   : > { %v4626_v10 = vpop.permute.xlu0 %4625 }
 0x928   : > { %v4628_v11 = vunpack.i.h.bf16 %v4626_v10  ;;  %v4627_v12 = vunpack.i.l.bf16 %v4626_v10 }
 0x92a   : > { %v4460_v24 = vpack.c.bf16 %v4628_v11, %v4627_v12  ;;  %v4711_v30 = vpop.eup %4710 }
 0x92b   : > { %v4636_v26 = vpop.permute.xlu0 %4635  ;;  %v2544_v39 = vmul.f32 %v4711_v30, %v4703_v15 }
 0x92c   : > { %v4638_v28 = vunpack.i.h.bf16 %v4636_v26  ;;  %v4637_v29 = vunpack.i.l.bf16 %v4636_v26  ;;  %4461 = vmatprep.subr.bf16.mxu0 %v4460_v24 }
 0x92d   : > { %4463 = vmatpush3.bf16.msra.mxu0 %v4460_v24 }
 0x92e   : > { %v4713_v31 = vpop.eup %4712  ;;  %v4468_v34 = vpack.c.bf16 %v4638_v28, %v4637_v29  ;;  %4510 = vmatprep.subr.msk.bf16.mxu0 %vm2204_vm7, %v1178_v27 }
 0x92f   : > { %v4641_v37 = vpop.permute.xlu0 %4640  ;;  %v2543_v38 = vmul.f32 %v4713_v31, %v4705_v17 }
 0x930   : > { %v4643_v40 = vunpack.i.h.bf16 %v4641_v37  ;;  %v4642_v41 = vunpack.i.l.bf16 %v4641_v37  ;;  %4328 = vmatmul.mubr.msk.f32.vlgmr.msra.gmra.mrb[10].mxu0 %vm1579_vm6, %v2542_v32  ;;  %4470 = vmatprep.subr.msk.bf16.mxu1 %vm5553_vm4, %v4468_v34 }
 0x931   : > { %4334 = vmatprep.mubr.msk.f32.mxu1 %vm1579_vm6, %v2543_v38  ;;  %4338 = vmatpush3.bf16.msra.mxu0 %v2728_v36 }
 0x932   : > { %v4474_v42 = vpack.c.bf16 %v4643_v40, %v4642_v41  ;;  %4335 = vmatmul.mubr.msk.f32.vlgmr.msra.gmra.mrb[22].mxu1 %vm1579_vm6, %v2544_v39  ;;  %v1179_v41 = vld [vmem:[%s5480_s25 + $0xc] sm:$0xf] }
 0x933   : > { %4473 = vmatpush3.bf16.xpose.msk.msra.mxu1 %vm5553_vm4, %v4468_v34  ;;  %v2784_v43 = vpop.permute.xlu0 %2783 }
 0x934   : > { %4347 = vmatprep.mubr.msk.f32.mxu1 %vm1398_vm3, %v2784_v43  ;;  %4476 = vmatprep.subr.msk.bf16.mxu0 %vm5553_vm4, %v4474_v42 }
 0x937   : > { %v2786_v44 = vpop.permute.xlu0 %2785 }
 0x93a   : > { %4348 = vmatmul.mubr.msk.f32.vlgmr.msra.gmra.mrb[24].mxu1 %vm1398_vm3, %v2786_v44 }
 0x93b   : > { %v2875_v56 = vpop.permute.xlu0 %2874 }
 0xa03   : > { %v4329_v46 = vpop.f32.mrb[10].mxu0 }
 0xa04   : > { %v2623_v48 = vpop.f32.mrb[11].mxu0 }
 0xa05   : > { %v2719_v50 = vpack.c.bf16 %v4329_v46, %v2623_v48  ;;  %v4336_v51 = vpop.f32.mrb[22].mxu1 }
 0xa06   : > { %v2710_v54 = vpop.f32.mrb[23].mxu1 }
 0xa07   : > { %v2720_v55 = vpack.c.bf16 %v4336_v51, %v2710_v54  ;;  %4339 = vmatprep.mubr.msk.bf16.mxu0 %vm1398_vm3, %v2719_v50  ;;  %v4071_v54 = vld [vmem:[%s6010_s3] ss:$0 sm:$0xff] }
 0xa09   : > { %4340 = vmatmul.mubr.msk.bf16.vlgmr.msra.gmra.mrb[12].mxu0 %vm1398_vm3, %v2720_v55 }
 0xa0a   : > { %4479 = vmatpush3.bf16.xpose.msk.msra.mxu0 %vm5553_vm4, %v4474_v42  ;;  %4354 = vmatprep.mubr.msk.f32.mxu0 %vm1398_vm3, %v2875_v56  ;;  %v3196_v42 = vsel %vm2204_vm7, %v1179_v41, 0 }
 0xa0d   : > { %v4349_v57 = vpop.f32.mrb[24].mxu1 }
 0xa0e   : > { %v2966_v58 = vsel %vm1397_vm5, %v4349_v57, -1e+30  ;;  %v2865_v59 = vpop.f32.mrb[25].mxu1 }
 0xa0f   : > { %v2965_v60 = vsel %vm1397_vm5, %v2865_v59, -1e+30  ;;  %v2972_v61 = vsel %vm1579_vm6, %v2966_v58, -inf }
 0xa10   : > { %2973 = vmax.xlane.f32.xlu1 %v2972_v61  ;;  %v2969_v63 = vsel %vm1579_vm6, %v2965_v60, -inf }
 0xa11   : > { %2970 = vmax.xlane.f32.xlu0 %v2969_v63  ;;  %4355 = vmatmul.mubr.msk.f32.vlgmr.msra.gmra.mrb[16].mxu0 %vm1398_vm3, %v2877_v62  ;;  %v4746_v63 = vld [vmem:[#allocation2] sm:$0xff] }
 0xa9d   : > { %v2974_v13 = vpop.xlane.xlu1 %2973 }
 0xa9e   : > { %v2971_v45 = vpop.xlane.xlu0 %2970  ;;  %v2982_v14 = vsub.f32 %v2966_v58, %v2974_v13 }
 0xa9f   : > { %v2981_v3 = vsub.f32 %v2965_v60, %v2971_v45 }
 0xaa0   : > { %v2987_v15 = vmul.f32 1.442695, %v2982_v14 }
 0xaa1   : > { %v2985_v5 = vmul.f32 1.442695, %v2981_v3 }
 0xaa3   : > { %4714 = vpow2.f32 %v2985_v5  ;;  %v4747_v5 = vld [vmem:[#allocation2 + $0x8] sm:$0xff] }
 0xaa4   : > { %4716 = vpow2.f32 %v2987_v15  ;;  %v4749_v15 = vld [vmem:[#allocation2 + $0x18] sm:$0xff] }
 0xaad   : > { %v4715_v6 = vpop.eup %4714 }
 0xaae   : > { %v2993_v0 = vsel %vm1579_vm6, %v4715_v6, 0.0  ;;  %v4717_v22 = vpop.eup %4716 }
 0xaaf   : > { %2994 = vadd.xlane.f32.xlu1 %v2993_v0  ;;  %v2996_v35 = vsel %vm1579_vm6, %v4717_v22, 0.0  ;;  %v4748_v0 = vld [vmem:[#allocation2 + $0x10] sm:$0xff] }
 0xae4   : > { %v4356_v16 = vpop.f32.mrb[16].mxu0 }
 0xae5   : > { %v2956_v17 = vpop.f32.mrb[17].mxu0  ;;  %v2968_v20 = vsel %vm1397_vm5, %v4356_v16, -1e+30 }
 0xae6   : > { %v2967_v18 = vsel %vm1397_vm5, %v2956_v17, -1e+30  ;;  %v2978_v21 = vsel %vm1579_vm6, %v2968_v20, -inf }
 0xae7   : > { %v2975_v19 = vsel %vm1579_vm6, %v2967_v18, -inf }
 0xae8   : > { %2976 = vmax.xlane.f32.xlu0 %v2975_v19 }
 0xaec   : > { %2979 = vmax.xlane.f32.xlu0 %v2978_v21 }
 0xaf0   : > { %2997 = vadd.xlane.f32.xlu0 %v2996_v35 }
 0xb3c   : > { %v2995_v47 = vpop.xlane.xlu1 %2994 }
 0xb3d   : > { %4718 = vrcp.f32 %v2995_v47 }
 0xb47   : > { %v4719_v49 = vpop.eup %4718 }
 0xb48   : > { %v3009_v52 = vmul.f32 %v4719_v49, %v4715_v6 }
 0xb4a   : > { %4361 = vmatprep.mubr.msk.f32.mxu1 %vm1579_vm6, %v3009_v52 }
 0xb75   : > { %v2977_v7 = vpop.xlane.xlu0 %2976 }
 0xb76   : > { %v2983_v8 = vsub.f32 %v2967_v18, %v2977_v7 }
 0xb78   : > { %v2989_v9 = vmul.f32 1.442695, %v2983_v8 }
 0xb79   : > { %v2980_v53 = vpop.xlane.xlu0 %2979 }
 0xb7a   : > { %4720 = vpow2.f32 %v2989_v9  ;;  %v2984_v4 = vsub.f32 %v2968_v20, %v2980_v53 }
 0xb7c   : > { %v2991_v23 = vmul.f32 1.442695, %v2984_v4 }
 0xb7d   : > { %v2998_v24 = vpop.xlane.xlu0 %2997 }
 0xb7e   : > { %4722 = vpow2.f32 %v2991_v23 }
 0xb7f   : > { %4724 = vrcp.f32 %v2998_v24 }
 0xb84   : > { %v4721_v33 = vpop.eup %4720 }
 0xb85   : > { %v2999_v10 = vsel %vm1579_vm6, %v4721_v33, 0.0 }
 0xb86   : > { %3000 = vadd.xlane.f32.xlu1 %v2999_v10 }
 0xb88   : > { %v4723_v11 = vpop.eup %4722 }
 0xb89   : > { %v3002_v12 = vsel %vm1579_vm6, %v4723_v11, 0.0  ;;  %v4725_v31 = vpop.eup %4724 }
 0xb8a   : > { %3003 = vadd.xlane.f32.xlu0 %v3002_v12  ;;  %v3010_v37 = vmul.f32 %v4725_v31, %v4717_v22 }
 0xb97   : > { %4645 = vrot.lane.b32.xlu1 %v5581_v1, %s5047_s19 }
 0xba0   : > { %4650 = vrot.lane.b32.xlu0 %v5583_v2, %s5047_s19 }
 0xc13   : > { %v3001_v25 = vpop.xlane.xlu1 %3000 }
 0xc14   : > { %4726 = vrcp.f32 %v3001_v25 }
 0xc17   : > { %v4646_v26 = vpop.permute.xlu1 %4645  ;;  %v3004_v27 = vpop.xlane.xlu0 %3003 }
 0xc18   : > { %v4648_v28 = vunpack.i.h.bf16 %v4646_v26  ;;  %v4647_v29 = vunpack.i.l.bf16 %v4646_v26  ;;  %4728 = vrcp.f32 %v3004_v27  ;;  %v4660_v26 = vld [vmem:[%s5489_s12] sm:$0xff]   ;;  %v4661_v27 = vld [vmem:[%s5489_s12 + $0x8] sm:$0xff]   ;;  %s6017_s12 = sld [smem:[#allocation35_spill]] (!%p4088_p12) }
 0xc1a   : > { %v4480_v30 = vpack.c.bf16 %v4648_v28, %v4647_v29  ;;  %v4662_v28 = vld [vmem:[%s5499_s7] sm:$0xff]   ;;  %v4663_v29 = vld [vmem:[%s5499_s7 + $0x8] sm:$0xff]  }
 0xc1b   : > { %v4651_v32 = vpop.permute.xlu0 %4650 }
 0xc1c   : > { %v4653_v34 = vunpack.i.h.bf16 %v4651_v32  ;;  %v4652_v36 = vunpack.i.l.bf16 %v4651_v32  ;;  %4481 = vmatprep.subr.bf16.mxu1 %v4480_v30 }
 0xc1d   : > { %4483 = vmatpush3.bf16.msra.mxu1 %v4480_v30 }
 0xc1e   : > { %v4727_v1 = vpop.eup %4726  ;;  %v4484_v2 = vpack.c.bf16 %v4653_v34, %v4652_v36  ;;  %4377 = vmatprep.subr.bf16.mxu1 %v4660_v26 }
 0xc1f   : > { %v3011_v38 = vmul.f32 %v4727_v1, %v4721_v33 }
 0xc20   : > { %4362 = vmatmul.mubr.msk.f32.vlgmr.msra.gmra.mrb[26].mxu1 %vm1579_vm6, %v3010_v37  ;;  %4485 = vmatprep.subr.bf16.mxu0 %v4484_v2 }
 0xc21   : > { %4487 = vmatpush3.bf16.msra.mxu0 %v4484_v2  ;;  %4368 = vmatprep.mubr.msk.f32.mxu0 %vm1579_vm6, %v3011_v38 }
 0xc22   : > { %v4729_v39 = vpop.eup %4728  ;;  %4511 = vmatprep.subr.msk.bf16.mxu0 %vm2204_vm7, %v1179_v41  ;;  %4378 = vmatpush3.bf16.msra.mxu1 %v4660_v26 }
 0xc23   : > { %v3012_v40 = vmul.f32 %v4729_v39, %v4723_v11  ;;  %4379 = vmatprep.subr.bf16.mxu1 %v4661_v27 }
 0xc25   : > { %4369 = vmatmul.mubr.msk.f32.vlgmr.msra.gmra.mrb[18].mxu0 %vm1579_vm6, %v3012_v40 }
 0xc26   : > { %4372 = vmatpush3.bf16.msra.mxu0 %v3196_v42  ;;  %4380 = vmatpush3.bf16.msra.mxu1 %v4661_v27 }
 0xc27   : > { %4385 = vmatprep.subr.bf16.mxu0 %v4662_v28 }
 0xcf3   : > { %v4363_v43 = vpop.f32.mrb[26].mxu1 }
 0xcf4   : > { %v3091_v44 = vpop.f32.mrb[27].mxu1 }
 0xcf5   : > { %v3187_v46 = vpack.c.bf16 %v4363_v43, %v3091_v44  ;;  %v4072_v43 = vld [vmem:[%s6011_s23] ss:$0 sm:$0xff] }
 0xcf7   : > { %4373 = vmatprep.mubr.msk.bf16.mxu0 %vm1398_vm3, %v3187_v46 }
 0xcf8   : > { %v4370_v48 = vpop.f32.mrb[18].mxu0 }
 0xcf9   : > { %v3178_v50 = vpop.f32.mrb[19].mxu0 }
 0xcfa   : > { %v3188_v51 = vpack.c.bf16 %v4370_v48, %v3178_v50 }
 0xcfc   : > { %4374 = vmatmul.mubr.msk.bf16.vlgmr.msra.gmra.mrb[12].mxu0 %vm1398_vm3, %v3188_v51 }
 0xcfd   : > { %4386 = vmatpush3.bf16.msra.mxu0 %v4662_v28 }
 0xcfe   : > { %4387 = vmatprep.subr.bf16.mxu0 %v4663_v29 }
 0xd01   : > { %4388 = vmatpush3.bf16.msra.mxu0 %v4663_v29 }
 0xdcf   : > { %v4375_v55 = vpop.f32.mrb[12].mxu0 }
 0xdd0   : > { %v3232_v56 = vpop.f32.mrb[13].mxu0  ;;  %v3260_v57 = vadd.f32 %v4375_v55, %v4071_v54 }
 0xdd1   : > { %v3258_v58 = vadd.f32 %v4071_v54, %v3232_v56  ;;  %v4376_v59 = vpop.f32.mrb[14].mxu0 }
 0xdd2   : > { %v3235_v60 = vpop.f32.mrb[15].mxu0  ;;  %v3261_v61 = vadd.f32 %v4376_v59, %v4071_v54  ;;  %v3264_v13 = vadd.f32 %v4748_v0, %v3260_v57  ;;  %v4665_v0 = vld [vmem:[%s5499_s7 + $0x18] sm:$0xff]  }
 0xdd3   : > { %v3259_v62 = vadd.f32 %v4071_v54, %v3235_v60  ;;  %v3262_v45 = vadd.f32 %v4746_v63, %v3258_v58  ;;  %v4073_v54 = vld [vmem:[%s6012_s6] ss:$0 sm:$0xff] }
 0xdd4   : > { %v3265_v16 = vadd.f32 %v4749_v15, %v3261_v61  ;;  %v3274_v17 = vsel %vm1199_vm2, %v3264_v13, 0.0 }
 0xdd5   : > { %v3268_v3 = vsel %vm1199_vm2, %v3262_v45, 0.0  ;;  %v3263_v6 = vadd.f32 %v4747_v5, %v3259_v62 }
 0xdd6   : > { %3269 = vadd.xlane.f32.xlu1 %v3268_v3  ;;  %v3277_v18 = vsel %vm1199_vm2, %v3265_v16, 0.0 }
 0xdd7   : > { %v3271_v14 = vsel %vm1199_vm2, %v3263_v6, 0.0 }
 0xdd8   : > { %3272 = vadd.xlane.f32.xlu0 %v3271_v14 }
 0xdda   : > { %3275 = vadd.xlane.f32.xlu1 %v3274_v17 }
 0xddc   : > { %3278 = vadd.xlane.f32.xlu0 %v3277_v18 }
 0xe63   : > { %v3270_v19 = vpop.xlane.xlu1 %3269 }
 0xe64   : > { %v3281_v20 = vmul.f32 0.03125, %v3270_v19 }
 0xe65   : > { %v3273_v21 = vpop.xlane.xlu0 %3272 }
 0xe66   : > { %v3285_v22 = vsub.f32 %v3262_v45, %v3281_v20  ;;  %v3282_v35 = vmul.f32 0.03125, %v3273_v21 }
 0xe67   : > { %v3276_v47 = vpop.xlane.xlu1 %3275 }
 0xe68   : > { %v3286_v49 = vsub.f32 %v3263_v6, %v3282_v35  ;;  %v3283_v52 = vmul.f32 0.03125, %v3276_v47  ;;  %v3289_v7 = vmul.f32 %v3285_v22, %v3285_v22  ;;  %v4664_v6 = vld [vmem:[%s5499_s7 + $0x10] sm:$0xff]   ;;  %s6014_s7 = scalar_lea.vmem [#allocation12], %s5427_s22 }
 0xe69   : > { %v3279_v8 = vpop.xlane.xlu0 %3278  ;;  %4389 = vmatprep.subr.bf16.mxu0 %v4664_v6 }
 0xe6a   : > { %v3287_v9 = vsub.f32 %v3264_v13, %v3283_v52  ;;  %v3284_v53 = vmul.f32 0.03125, %v3279_v8  ;;  %v3293_v4 = vsel %vm1199_vm2, %v3289_v7, 0.0  ;;  %v3290_v23 = vmul.f32 %v3286_v49, %v3286_v49  ;;  %4390 = vmatpush3.bf16.msra.mxu0 %v4664_v6  ;;  %v4074_v13 = vld [vmem:[%s6013_s26] ss:$0 sm:$0xff] }
 0xe6b   : > { %3294 = vadd.xlane.f32.xlu1 %v3293_v4  ;;  %4391 = vmatprep.subr.bf16.mxu0 %v4665_v0  ;;  %v4079_v8 = vld [vmem:[%s6014_s7] ss:$0 sm:$0xff] }
 0xe6c   : > { %v3288_v33 = vsub.f32 %v3265_v16, %v3284_v53  ;;  %v3296_v10 = vsel %vm1199_vm2, %v3290_v23, 0.0  ;;  %v3291_v11 = vmul.f32 %v3287_v9, %v3287_v9 }
 0xe6d   : > { %3297 = vadd.xlane.f32.xlu0 %v3296_v10 }
 0xe6e   : > { %v3299_v12 = vsel %vm1199_vm2, %v3291_v11, 0.0  ;;  %v3292_v24 = vmul.f32 %v3288_v33, %v3288_v33  ;;  %4392 = vmatpush3.bf16.msra.mxu0 %v4665_v0 }
 0xe6f   : > { %3300 = vadd.xlane.f32.xlu1 %v3299_v12 }
 0xe70   : > { %v3302_v25 = vsel %vm1199_vm2, %v3292_v24, 0.0 }
 0xe71   : > { %3303 = vadd.xlane.f32.xlu0 %v3302_v25 }
 0xef8   : > { %v3295_v30 = vpop.xlane.xlu1 %3294 }
 0xef9   : > { %v3305_v31 = vmul.f32 0.03125, %v3295_v30 }
 0xefa   : > { %v3298_v32 = vpop.xlane.xlu0 %3297 }
 0xefb   : > { %v3309_v34 = vadd.f32 1e-05, %v3305_v31  ;;  %v3306_v36 = vmul.f32 0.03125, %v3298_v32 }
 0xefc   : > { %v3301_v1 = vpop.xlane.xlu1 %3300 }
 0xefd   : > { %4730 = vrsqrt.f32 %v3309_v34  ;;  %v3310_v37 = vadd.f32 1e-05, %v3306_v36  ;;  %v3307_v2 = vmul.f32 0.03125, %v3301_v1 }
 0xefe   : > { %v3304_v38 = vpop.xlane.xlu0 %3303 }
 0xeff   : > { %4732 = vrsqrt.f32 %v3310_v37  ;;  %v3311_v39 = vadd.f32 1e-05, %v3307_v2  ;;  %v3308_v40 = vmul.f32 0.03125, %v3304_v38 }
 0xf01   : > { %4734 = vrsqrt.f32 %v3311_v39  ;;  %v3312_v41 = vadd.f32 1e-05, %v3308_v40 }
 0xf03   : > { %4736 = vrsqrt.f32 %v3312_v41 }
 0xf07   : > { %v4731_v42 = vpop.eup %4730 }
 0xf08   : > { %v3317_v44 = vmul.f32 %v4731_v42, %v3285_v22 }
 0xf09   : > { %v4733_v46 = vpop.eup %4732 }
 0xf0a   : > { %v3318_v48 = vmul.f32 %v4733_v46, %v3286_v49  ;;  %v3327_v50 = vmul.f32 %v4072_v43, %v3317_v44 }
 0xf0b   : > { %v4735_v51 = vpop.eup %4734 }
 0xf0c   : > { %v3319_v55 = vmul.f32 %v4735_v51, %v3287_v9  ;;  %v3328_v56 = vmul.f32 %v4072_v43, %v3318_v48  ;;  %v3337_v60 = vadd.f32 %v4073_v54, %v3327_v50 }
 0xf0d   : > { %v4737_v57 = vpop.eup %4736 }
 0xf0e   : > { %v3329_v58 = vmul.f32 %v4072_v43, %v3319_v55  ;;  %v3320_v59 = vmul.f32 %v4737_v57, %v3288_v33  ;;  %v3338_v61 = vadd.f32 %v4073_v54, %v3328_v56 }
 0xf10   : > { %v3330_v62 = vmul.f32 %v4072_v43, %v3320_v59  ;;  %v3341_v63 = vpack.c.bf16 %v3338_v61, %v3337_v60  ;;  %v3339_v45 = vadd.f32 %v4073_v54, %v3329_v58 }
 0xf12   : > { %4381 = vmatprep.mubr.msk.bf16.mxu1 %vm1199_vm2, %v3341_v63  ;;  %v3340_v3 = vadd.f32 %v4073_v54, %v3330_v62 }
 0xf14   : > { %v3342_v5 = vpack.c.bf16 %v3340_v3, %v3339_v45 }
 0xf16   : > { %4382 = vmatmul.mubr.msk.bf16.vlgmr.msra.gmra.mrb[28].mxu1 %vm1199_vm2, %v3342_v5 }
 0xfe9   : > { %v4383_v14 = vpop.f32.mrb[28].mxu1 }
 0xfea   : > { %v3415_v15 = vadd.f32 %v4383_v14, %v4074_v13  ;;  %v3406_v16 = vpop.f32.mrb[29].mxu1  ;;  %v4086_v14 = vld [vmem:[%s1038_s27] ss:$0 sm:$0xff]  ;;  %s6016_s27 = sld [smem:[#allocation37_spill]] (!%p4088_p12) }
 0xfeb   : > { %v3407_v17 = vadd.f32 %v4074_v13, %v3406_v16  ;;  %v4384_v18 = vpop.f32.mrb[30].mxu1 }
 0xfec   : > { %v3418_v19 = vadd.f32 %v4384_v18, %v4074_v13  ;;  %v3409_v20 = vpop.f32.mrb[31].mxu1  ;;  %v3423_v22 = vmax.f32 %v3415_v15, 0.0 }
 0xfed   : > { %v3410_v21 = vadd.f32 %v4074_v13, %v3409_v20  ;;  %v3421_v47 = vmax.f32 %v3407_v17, 0.0  ;;  %v4087_v17 = vld [vmem:[%s6015_s10] ss:$0 sm:$0xff] }
 0xfee   : > { %v3424_v35 = vmax.f32 %v3418_v19, 0.0 }
 0xfef   : > { %v3422_v49 = vmax.f32 %v3410_v21, 0.0 }
 0xff0   : > { %v3426_v52 = vpack.c.bf16 %v3424_v35, %v3423_v22 }
 0xff1   : > { %v3425_v7 = vpack.c.bf16 %v3422_v49, %v3421_v47 }
 0xff3   : > { %4393 = vmatprep.mubr.msk.bf16.mxu0 %vm3466_vm8, %v3425_v7 }
 0xff4   : > { %4394 = vmatmul.mubr.msk.bf16.vlgmr.msra.gmra.mrb[20].mxu0 %vm3466_vm8, %v3426_v52 }
0x10c7   : > { %v4395_v9 = vpop.f32.mrb[20].mxu0 }
0x10c8   : > { %v3507_v53 = vpop.f32.mrb[21].mxu0  ;;  %v3516_v4 = vadd.f32 %v4395_v9, %v4079_v8 }
0x10c9   : > { %v3508_v23 = vadd.f32 %v4079_v8, %v3507_v53  ;;  %v4396_v33 = vpop.f32.mrb[22].mxu0 }
0x10ca   : > { %v3510_v10 = vpop.f32.mrb[23].mxu0  ;;  %v3519_v11 = vadd.f32 %v4396_v33, %v4079_v8  ;;  %v3524_v27 = vadd.f32 %v3516_v4, %v3339_v45  ;;  %v3612_v4 = vld [vmem:[%s6017_s12] sm:$0xff] (!%p4088_p12)  ;;  %v3614_v33 = vld [vmem:[%s6017_s12 + $0x10] sm:$0xff] (!%p4088_p12) }
0x10cb   : > { %v3511_v12 = vadd.f32 %v4079_v8, %v3510_v10  ;;  %v3522_v24 = vadd.f32 %v3508_v23, %v3337_v60  ;;  %v3613_v23 = vld [vmem:[%s6017_s12 + $0x8] sm:$0xff] (!%p4088_p12)  ;;  %v5048_v10 = vmov (!%p4088_p12), 0.0|0.0  }
0x10cc   : > { %v3525_v29 = vadd.f32 %v3519_v11, %v3340_v3  ;;  %v3534_v30 = vsel %vm1199_vm2, %v3524_v27, 0.0  ;;  %4488 = vmatprep.subr.bf16.mxu0 (!%p4088_p12), %v5048_v10  ;;  %v4489_v11 = vpack.c.bf16 (!%p4088_p12), %v3613_v23, %v3612_v4 }
0x10cd   : > { %v3528_v25 = vsel %vm1199_vm2, %v3522_v24, 0.0  ;;  %v3523_v26 = vadd.f32 %v3511_v12, %v3338_v61  ;;  %v3615_v12 = vld [vmem:[%s6017_s12 + $0x18] sm:$0xff] (!%p4088_p12) }
0x10ce   : > { %3529 = vadd.xlane.f32.xlu1 %v3528_v25  ;;  %v3537_v31 = vsel %vm1199_vm2, %v3525_v29, 0.0  ;;  %4490 = vmatpush3.bf16.msra.mxu0 (!%p4088_p12), %v4489_v11  ;;  %v4492_v25 = vpack.c.bf16 (!%p4088_p12), %v3615_v12, %v3614_v33 }
0x10cf   : > { %v3531_v28 = vsel %vm1199_vm2, %v3523_v26, 0.0  ;;  %4491 = vmatprep.subr.bf16.mxu0 (!%p4088_p12), %v5048_v10 }
0x10d0   : > { %3532 = vadd.xlane.f32.xlu0 %v3531_v28  ;;  %v4089_v28 = vld [vmem:[%s6018_s20] ss:$0 sm:$0xff] (!%p4088_p12) }
0x10d2   : > { %3535 = vadd.xlane.f32.xlu1 %v3534_v30  ;;  %4493 = vmatpush3.bf16.msra.mxu0 (!%p4088_p12), %v4492_v25 }
0x10d4   : > { %3538 = vadd.xlane.f32.xlu0 %v3537_v31 }
0x115b   : > { %v3530_v32 = vpop.xlane.xlu1 %3529 }
0x115c   : > { %v3540_v34 = vmul.f32 0.03125, %v3530_v32 }
0x115d   : > { %v3533_v36 = vpop.xlane.xlu0 %3532 }
0x115e   : > { %v3544_v1 = vsub.f32 %v3522_v24, %v3540_v34  ;;  %v3541_v37 = vmul.f32 0.03125, %v3533_v36  ;;  %v5050_v24 = vmov (!%p4088_p12), 0.0  }
0x115f   : > { %v3536_v2 = vpop.xlane.xlu1 %3535  ;;  %4405 = vmatprep.mubr.msk.f32.mxu0 (!%p4088_p12), %vm5049_vm9, %v5050_v24 }
0x1160   : > { %v3545_v38 = vsub.f32 %v3523_v26, %v3541_v37  ;;  %v3542_v39 = vmul.f32 0.03125, %v3536_v2  ;;  %v3548_v40 = vmul.f32 %v3544_v1, %v3544_v1 }
0x1161   : > { %v3539_v41 = vpop.xlane.xlu0 %3538 }
0x1162   : > { %v3546_v42 = vsub.f32 %v3524_v27, %v3542_v39  ;;  %v3543_v43 = vmul.f32 0.03125, %v3539_v41  ;;  %v3552_v44 = vsel %vm1199_vm2, %v3548_v40, 0.0  ;;  %v3549_v46 = vmul.f32 %v3545_v38, %v3545_v38 }
0x1163   : > { %3553 = vadd.xlane.f32.xlu1 %v3552_v44 }
0x1164   : > { %v3547_v48 = vsub.f32 %v3525_v29, %v3543_v43  ;;  %v3555_v50 = vsel %vm1199_vm2, %v3549_v46, 0.0  ;;  %v3550_v51 = vmul.f32 %v3546_v42, %v3546_v42 }
0x1165   : > { %3556 = vadd.xlane.f32.xlu0 %v3555_v50 }
0x1166   : > { %v3558_v54 = vsel %vm1199_vm2, %v3550_v51, 0.0  ;;  %v3551_v55 = vmul.f32 %v3547_v48, %v3547_v48 }
0x1167   : > { %3559 = vadd.xlane.f32.xlu1 %v3558_v54 }
0x1168   : > { %v3561_v56 = vsel %vm1199_vm2, %v3551_v55, 0.0 }
0x1169   : > { %3562 = vadd.xlane.f32.xlu0 %v3561_v56 }
0x11f0   : > { %v3554_v57 = vpop.xlane.xlu1 %3553 }
0x11f1   : > { %v3564_v58 = vmul.f32 0.03125, %v3554_v57 }
0x11f2   : > { %v3557_v59 = vpop.xlane.xlu0 %3556 }
0x11f3   : > { %v3568_v60 = vadd.f32 1e-05, %v3564_v58  ;;  %v3565_v61 = vmul.f32 0.03125, %v3557_v59 }
0x11f4   : > { %v3560_v62 = vpop.xlane.xlu1 %3559 }
0x11f5   : > { %4738 = vrsqrt.f32 %v3568_v60  ;;  %v3569_v63 = vadd.f32 1e-05, %v3565_v61  ;;  %v3566_v45 = vmul.f32 0.03125, %v3560_v62 }
0x11f6   : > { %v3563_v3 = vpop.xlane.xlu0 %3562 }
0x11f7   : > { %4740 = vrsqrt.f32 %v3569_v63  ;;  %v3570_v5 = vadd.f32 1e-05, %v3566_v45  ;;  %v3567_v6 = vmul.f32 0.03125, %v3563_v3 }
0x11f9   : > { %4742 = vrsqrt.f32 %v3570_v5  ;;  %v3571_v0 = vadd.f32 1e-05, %v3567_v6 }
0x11fb   : > { %4744 = vrsqrt.f32 %v3571_v0 }
0x11ff   : > { %v4739_v13 = vpop.eup %4738 }
0x1200   : > { %v3576_v15 = vmul.f32 %v4739_v13, %v3544_v1 }
0x1201   : > { %v4741_v16 = vpop.eup %4740 }
0x1202   : > { %v3586_v18 = vmul.f32 %v4086_v14, %v3576_v15  ;;  %v3577_v19 = vmul.f32 %v4741_v16, %v3545_v38 }
0x1203   : > { %v4743_v20 = vpop.eup %4742 }
0x1204   : > { %v3596_v21 = vadd.f32 %v4087_v17, %v3586_v18  ;;  %v3587_v22 = vmul.f32 %v4086_v14, %v3577_v19  ;;  %v3578_v35 = vmul.f32 %v4743_v20, %v3546_v42 }
0x1205   : > { %v4745_v47 = vpop.eup %4744 }
0x1206   : > { %3600 = vst.msk [vmem:[#allocation2] sm:$0xff] %vm1199_vm2, %v3596_v21  ;;  %v3597_v49 = vadd.f32 %v4087_v17, %v3587_v22  ;;  %v3588_v52 = vmul.f32 %v4086_v14, %v3578_v35  ;;  %v3579_v7 = vmul.f32 %v4745_v47, %v3547_v48  ;;  %3607 = sbr.rel (%p4088_p12) target bundleno = 4836 (0x12e4), region = 140  ;;  %3608 = vst.msk [vmem:[%s6016_s27] sm:$0xff] (!%p4088_p12), %vm1199_vm2, %v3596_v21 }
0x1208   : > { %3601 = vst.msk [vmem:[#allocation2 + $0x8] sm:$0xff] %vm1199_vm2, %v3597_v49  ;;  %v3598_v8 = vadd.f32 %v4087_v17, %v3588_v52  ;;  %v3589_v9 = vmul.f32 %v4086_v14, %v3579_v7  ;;  %3609 = vst.msk [vmem:[%s6016_s27 + $0x8] sm:$0xff] (!%p4088_p12), %vm1199_vm2, %v3597_v49 }
0x120a   : > { %3602 = vst.msk [vmem:[#allocation2 + $0x10] sm:$0xff] %vm1199_vm2, %v3598_v8  ;;  %v3599_v53 = vadd.f32 %v4087_v17, %v3589_v9  ;;  %3610 = vst.msk [vmem:[%s6016_s27 + $0x10] sm:$0xff] (!%p4088_p12), %vm1199_vm2, %v3598_v8  ;;  %v3625_v26 = vrot.slane (!%p4088_p12), %v3598_v8, 7 }
0x120c   : > { %3603 = vst.msk [vmem:[#allocation2 + $0x18] sm:$0xff] %vm1199_vm2, %v3599_v53  ;;  %3611 = vst.msk [vmem:[%s6016_s27 + $0x18] sm:$0xff] (!%p4088_p12), %vm1199_vm2, %v3599_v53  ;;  %v3627_v27 = vsel (!%p4088_p12), %vm3626_vm10, %v3625_v26, %v3596_v21 }
0x120d   : > { %4406 = vmatmul.mubr.msk.f32.vlgmr.msra.gmra.mrb[0].mxu0 %vm1199_vm2, %v3627_v27 }
0x12e0   : > { %v3696_v29 = vpop.f32.mrb[0].mxu0 }
0x12e1   : > { %v3697_v30 = vadd.f32 %v4089_v28, %v3696_v29  ;;  %v4407_v31 = vpop.f32.mrb[1].mxu0 }
0x12e3   : > { %3701 = vst.msk [vmem:[#allocation15] sm:$0x3] %vm3700_vm11, %v3697_v30 }
0x12e4 PF: > { %p4553_p0 = scmp.eq.s32.totalorder %s5186_s4, 1  ;;  %s5051_s8 = smov [#allocation15]  }
0x12e5   : > { %s3712_s29 = sshll.u32 %s5051_s8, 4  ;;  %s3713_s29 = int_to_ptr.vmem [resolvable:$true] %s3712_s29 }
0x12e6   : > { %s4960_s5 = scalar_lea.vmem %s3713_s29, 32  ;;  %p4967_p8 = scmp.lt.s32.totalorder %s3713_s29, %s3713_s29 }
0x12e7   : > { %p4961_p2 = scmp.ne.s32.totalorder %s3713_s29, %s4960_s5  ;;  %p4968_p3 = scmp.lt.s32.totalorder %s4960_s5, %s4960_s5 }
0x12e9   : > { %p4962_p13 = pnand %p4961_p2, %p4553_p0  ;;  %p4969_p5 = por %p4968_p3, %p4967_p8 }
0x12eb   : > { %p4963_p7 = pneg %p4962_p13 }
0x12ed   : > { %p4970_p4 = pnand %p4969_p5, %p4963_p7 }
0x12ef   : > { %4973 = shalt.err (!%p4970_p4)
}
0x12f0   : > { %s6019_s19 = sld [smem:[#allocation38_spill]] }
0x12f6   : > { %s4974_s3 = scalar_lea.hbm %s6019_s19, 32 }
0x12f7   : > { %p4975_p6 = scmp.ne.s32.totalorder %s6019_s19, %s4974_s3  ;;  %p4980_p9 = scmp.lt.u32.totalorder %s4974_s3, %s6019_s19 }
0x12f9   : > { %p4976_p10 = pnand %p4975_p6, %p4553_p0 }
0x12fb   : > { %p4977_p11 = pneg %p4976_p10 }
0x12fd   : > { %p4982_p1 = pnand %p4980_p9, %p4977_p11 }
0x12ff   : > { %4985 = shalt.err (!%p4982_p1)
}
0x1300   : > { %4527 = dma.vmem_to_hbm [thread:$0]  (%p4553_p0), %s3713_s29, 32, %s6019_s19, [#allocation5]  }
0x1301   : > { %5019 = dma.done.wait (%p4553_p0), [#allocation5], 32  }
0x1302   : > { %5021 = vsyncadd (%p4553_p0), [#allocation5], 4294967264 }
0x1303 PF: > { %s6020_s30 = sld [smem:[#allocation22_spill]]  ;;  %s6021_s2 = sld [smem:[#allocation21_spill]] }
0x1304   : > { %s6022_s29 = sld [smem:[#allocation23_spill]]  ;;  %s6023_s3 = smov %s5028_s28 }
0x1309   : > { %p43_p12 = scmp.ge.s32.totalorder %s6020_s30, 4   ;;  %s6024_s28 = smov %s6021_s2 }
0x130b   :  { %45 = sbr.rel (!%p43_p12) target bundleno = 26 (0x1a), region = 256 }
0x1312   :  { %3728 = vsyncpa [#allocation4], 1 }
0x1313   :  { %3730 = vsyncpa [#allocation4 + $0x1], 1 }
0x1314   :  { %3731 = vsyncpa [#allocation7], 1 }
0x1315   :  { %3733 = vsyncpa [#allocation7 + $0x1], 1 }
0x1316   :  { %3734 = vsyncpa [#allocation10], 1 }
0x1317   :  { %3736 = vsyncpa [#allocation10 + $0x1], 1 }
0x1318   :  { %3737 = vsyncpa [#allocation13], 1 }
0x1319   :  { %3739 = vsyncpa [#allocation13 + $0x1], 1 }
0x131a   :  { %3740 = vsyncpa [#allocation5], 1 }
0x131b   :  { %3742 = vsyncpa [#allocation5 + $0x1], 1 }

</bundles_post_ra>
